<compile_context>
chip_gen: v7x
topology: tpu7x:2x2x1
jax: 0.10.0
libtpu: 0.0.40
codegen_flags: <defaults>
</compile_context>

<pallas_src>
import functools
import math

import jax
import jax.numpy as jnp
from jax.experimental import pallas as pl
from jax.experimental.pallas import tpu as pltpu


N_PREFIX = 3  # the reference module hard-codes x[:, :, :3] as the "global" tokens


def _self_attention_kernel(
    x_ref,
    wq_e_ref, wkv_e_ref, wo_e_ref, bq_e_ref, bkv_e_ref, bo_e_ref,
    wq_d_ref, wkv_d_ref, wo_d_ref, bq_d_ref, bkv_d_ref, bo_d_ref,
    w1_ref, b1_ref, w2_ref, b2_ref,
    ln1_g_ref, ln1_b_ref, ln2_g_ref, ln2_b_ref,
    o_ref,
    xp_ref,
    *, num_heads, head_dim, patch_len, eps):
  """One (batch, node) tile: x_ref / o_ref are (L, D); xp_ref is (L, D) scratch."""
  L, _ = x_ref.shape
  d_model = num_heads * head_dim
  q_scale = 1.0 / math.sqrt(head_dim)

  def mha(xq, xk, wq_ref, wkv_ref, wo_ref, bq_ref, bkv_ref, bo_ref):
    """Multi-head attention: queries = xq rows, keys/values = xk rows.
    bf16 matmul operands, f32 accumulation and f32 softmax statistics."""
    q = jnp.dot(xq.astype(jnp.bfloat16), wq_ref[...],
                preferred_element_type=jnp.float32) + bq_ref[...]
    kv = jnp.dot(xk.astype(jnp.bfloat16), wkv_ref[...],
                 preferred_element_type=jnp.float32) + bkv_ref[...]
    q = q * q_scale                       # fold 1/sqrt(head_dim) into Q once
    k = kv[:, :d_model]
    v = kv[:, d_model:]
    heads = []
    for h in range(num_heads):            # static unroll; H is small
      lo = h * head_dim
      s = jax.lax.dot_general(            # (Tq, Tk) scores for this head
          q[:, lo:lo + head_dim].astype(jnp.bfloat16),
          k[:, lo:lo + head_dim].astype(jnp.bfloat16),
          (((1,), (1,)), ((), ())), preferred_element_type=jnp.float32)
      m = jnp.max(s, axis=-1, keepdims=True)
      e = jnp.exp(s - m)
      p = e * pl.reciprocal(jnp.sum(e, axis=-1, keepdims=True), approx=True)
      # TODO(synk): nn.Dropout on the attention scores is inference-mode identity.
      heads.append(jnp.dot(p.astype(jnp.bfloat16),
                           v[:, lo:lo + head_dim].astype(jnp.bfloat16),
                           preferred_element_type=jnp.float32))
    # One lane-concat + ONE output-projection matmul (contraction over full D),
    # instead of H tiny head_dim contractions accumulated serially.
    cat = jnp.concatenate(heads, axis=-1)
    return jnp.dot(cat.astype(jnp.bfloat16), wo_ref[...],
                   preferred_element_type=jnp.float32) + bo_ref[...]

  def layer_norm(y, gamma, beta):
    mu = jnp.mean(y, axis=-1, keepdims=True)
    c = y - mu
    var = jnp.mean(c * c, axis=-1, keepdims=True)
    return c * jax.lax.rsqrt(var + eps) * gamma + beta

  x = x_ref[...]                          # (L, D) f32 for this (batch, node)
  x_rest = x[N_PREFIX:, :]                # residual / dattn queries (unchanged rows)

  # --- eattn: ONLY the 3 prefix query rows attend to the last patch_len rows ---
  g = mha(x[:N_PREFIX, :], x[L - patch_len:, :],
          wq_e_ref, wkv_e_ref, wo_e_ref, bq_e_ref, bkv_e_ref, bo_e_ref)

  # torch: x[:, :, :3] = g  ->  build xp with cheap row stores into VMEM scratch.
  xp_ref[...] = x
  xp_ref[pl.ds(0, N_PREFIX), :] = g
  xp = xp_ref[...]

  # --- dattn: non-prefix query rows attend to every row of xp (same node) ---
  attn = mha(x_rest, xp,
             wq_d_ref, wkv_d_ref, wo_d_ref, bq_d_ref, bkv_d_ref, bo_d_ref)

  # --- residual + LN1, feed-forward, residual + LN2 (dropout1/2 = identity) ---
  y1 = layer_norm(x_rest + attn, ln1_g_ref[...], ln1_b_ref[...])
  h1 = jnp.maximum(
      jnp.dot(y1.astype(jnp.bfloat16), w1_ref[...],
              preferred_element_type=jnp.float32) + b1_ref[...], 0.0)
  ff = jnp.dot(h1.astype(jnp.bfloat16), w2_ref[...],
               preferred_element_type=jnp.float32) + b2_ref[...]
  y2 = layer_norm(y1 + ff, ln2_g_ref[...], ln2_b_ref[...])

  # --- torch.cat((g, out), dim=-2): direct row stores into the output block ---
  o_ref[pl.ds(0, N_PREFIX), :] = g.astype(o_ref.dtype)
  o_ref[pl.ds(N_PREFIX, L - N_PREFIX), :] = y2.astype(o_ref.dtype)


_MATMUL_WEIGHTS = frozenset(
    {"wq_e", "wkv_e", "wo_e", "wq_d", "wkv_d", "wo_d", "w1", "w2"})

_PARAM_ORDER = ("wq_e", "wkv_e", "wo_e", "bq_e", "bkv_e", "bo_e",
                "wq_d", "wkv_d", "wo_d", "bq_d", "bkv_d", "bo_d",
                "w1", "b1", "w2", "b2",
                "ln1_g", "ln1_b", "ln2_g", "ln2_b")


def self_attention_layer_forward(X, params, *, num_heads, in_steps):
  """X: (B, num_nodes, L, model_dim); attention across dim=-2 (module default)."""
  B, N, L, D = X.shape
  patch_len = in_steps

  # bf16 operands for every MXU matmul (native input dtype on v5e/v6e/v7x);
  # biases / LayerNorm params stay f32 and are applied on the f32 accumulators.
  weights = [params[k].astype(jnp.bfloat16) if k in _MATMUL_WEIGHTS else params[k]
             for k in _PARAM_ORDER]

  tile_spec = pl.BlockSpec((None, None, L, D), lambda b, n: (b, n, 0, 0))

  def rep(a):
    # Grid-invariant block (constant index_map): DMA'd once, reused every step.
    # TODO(synk): could request single-buffering via pipeline_mode=pl.Buffered(1);
    # the saving is negligible at D=32 so it is left at the default here.
    return pl.BlockSpec(a.shape, lambda b, n: (0,) * a.ndim)

  kernel = functools.partial(
      _self_attention_kernel, num_heads=num_heads, head_dim=D // num_heads,
      patch_len=patch_len, eps=1e-5)

  return pl.pallas_call(
      kernel,
      out_shape=jax.ShapeDtypeStruct((B, N, L, D), X.dtype),
      grid=(B, N),
      in_specs=[tile_spec] + [rep(w) for w in weights],
      out_specs=pl.BlockSpec((None, None, L, D), lambda b, n: (b, n, 0, 0)),
      scratch_shapes=[pltpu.VMEM((L, D), jnp.float32)],
      compiler_params=pltpu.CompilerParams(
          dimension_semantics=("parallel", "parallel")),
  )(X, *weights)


def init_params(key, model_dim):
  D = model_dim
  ki = iter(jax.random.split(key, 16))

  def w(shape, scale=0.05):
    return (scale * jax.random.normal(next(ki), shape)).astype(jnp.float32)

  return {
      # eattn: FC_Q separate (applies to prefix rows only), FC_K/FC_V fused as
      # one (D, 2D) weight (applies to the patch rows only); stored (in, out).
      "wq_e": w((D, D)), "bq_e": w((1, D)),
      "wkv_e": w((D, 2 * D)), "bkv_e": w((1, 2 * D)),
      "wo_e": w((D, D)), "bo_e": w((1, D)),
      # dattn
      "wq_d": w((D, D)), "bq_d": w((1, D)),
      "wkv_d": w((D, 2 * D)), "bkv_d": w((1, 2 * D)),
      "wo_d": w((D, D)), "bo_d": w((1, D)),
      # feed-forward
      "w1": w((D, 4 * D)), "b1": w((1, 4 * D)),
      "w2": w((4 * D, D)), "b2": w((1, D)),
      # LayerNorms
      "ln1_g": jnp.ones((1, D), jnp.float32), "ln1_b": jnp.zeros((1, D), jnp.float32),
      "ln2_g": jnp.ones((1, D), jnp.float32), "ln2_b": jnp.zeros((1, D), jnp.float32),
  }


if __name__ == "__main__":
  B, N, D, H, in_steps = 2, 4, 32, 4, 12    # batch, num_nodes, model_dim, heads
  L = N_PREFIX + in_steps                   # 3 global tokens + one patch = 15
  key = jax.random.PRNGKey(0)
  kx, kp = jax.random.split(key)
  X = jax.random.normal(kx, (B, N, L, D), dtype=jnp.float32)
  params = init_params(kp, D)

  fwd = jax.jit(functools.partial(self_attention_layer_forward,
                                  num_heads=H, in_steps=in_steps))
  out = fwd(X, params)
  jax.block_until_ready(out)
  assert out.shape == (B, N, L, D) and out.dtype == jnp.float32
  assert bool(jnp.all(jnp.isfinite(out)))
  print("KERNEL_OK")
</pallas_src>

<mosaic_0001>
module attributes {stable_mosaic.version = 11 : i64} {
  func.func @_self_attention_kernel(%arg0: i32, %arg1: i32, %arg2: memref<1x1x15x32xf32, #tpu.memory_space<vmem>>, %arg3: memref<32x32xbf16, #tpu.memory_space<vmem>>, %arg4: memref<32x64xbf16, #tpu.memory_space<vmem>>, %arg5: memref<32x32xbf16, #tpu.memory_space<vmem>>, %arg6: memref<1x32xf32, #tpu.memory_space<vmem>>, %arg7: memref<1x64xf32, #tpu.memory_space<vmem>>, %arg8: memref<1x32xf32, #tpu.memory_space<vmem>>, %arg9: memref<32x32xbf16, #tpu.memory_space<vmem>>, %arg10: memref<32x64xbf16, #tpu.memory_space<vmem>>, %arg11: memref<32x32xbf16, #tpu.memory_space<vmem>>, %arg12: memref<1x32xf32, #tpu.memory_space<vmem>>, %arg13: memref<1x64xf32, #tpu.memory_space<vmem>>, %arg14: memref<1x32xf32, #tpu.memory_space<vmem>>, %arg15: memref<32x128xbf16, #tpu.memory_space<vmem>>, %arg16: memref<1x128xf32, #tpu.memory_space<vmem>>, %arg17: memref<128x32xbf16, #tpu.memory_space<vmem>>, %arg18: memref<1x32xf32, #tpu.memory_space<vmem>>, %arg19: memref<1x32xf32, #tpu.memory_space<vmem>>, %arg20: memref<1x32xf32, #tpu.memory_space<vmem>>, %arg21: memref<1x32xf32, #tpu.memory_space<vmem>>, %arg22: memref<1x32xf32, #tpu.memory_space<vmem>>, %arg23: memref<1x1x15x32xf32, #tpu.memory_space<vmem>>, %arg24: memref<15x32xf32, #tpu.memory_space<vmem>>) attributes {dimension_semantics = [#tpu.dimension_semantics<parallel>, #tpu.dimension_semantics<parallel>], iteration_bounds = array<i64: 2, 4>, scalar_prefetch = 0 : i64, scratch_operands = 1 : i64, tpu.core_type = #tpu.core_type<tc>, window_params = [{transform_indices = @transform_0, window_bounds = array<i64: 1, 1, 15, 32>}, {pipeline_mode = #tpu.pipeline_mode<synchronous>, transform_indices = @transform_1, window_bounds = array<i64: 32, 32>}, {pipeline_mode = #tpu.pipeline_mode<synchronous>, transform_indices = @transform_2, window_bounds = array<i64: 32, 64>}, {pipeline_mode = #tpu.pipeline_mode<synchronous>, transform_indices = @transform_3, window_bounds = array<i64: 32, 32>}, {pipeline_mode = #tpu.pipeline_mode<synchronous>, transform_indices = @transform_4, window_bounds = array<i64: 1, 32>}, {pipeline_mode = #tpu.pipeline_mode<synchronous>, transform_indices = @transform_5, window_bounds = array<i64: 1, 64>}, {pipeline_mode = #tpu.pipeline_mode<synchronous>, transform_indices = @transform_6, window_bounds = array<i64: 1, 32>}, {pipeline_mode = #tpu.pipeline_mode<synchronous>, transform_indices = @transform_7, window_bounds = array<i64: 32, 32>}, {pipeline_mode = #tpu.pipeline_mode<synchronous>, transform_indices = @transform_8, window_bounds = array<i64: 32, 64>}, {pipeline_mode = #tpu.pipeline_mode<synchronous>, transform_indices = @transform_9, window_bounds = array<i64: 32, 32>}, {pipeline_mode = #tpu.pipeline_mode<synchronous>, transform_indices = @transform_10, window_bounds = array<i64: 1, 32>}, {pipeline_mode = #tpu.pipeline_mode<synchronous>, transform_indices = @transform_11, window_bounds = array<i64: 1, 64>}, {pipeline_mode = #tpu.pipeline_mode<synchronous>, transform_indices = @transform_12, window_bounds = array<i64: 1, 32>}, {pipeline_mode = #tpu.pipeline_mode<synchronous>, transform_indices = @transform_13, window_bounds = array<i64: 32, 128>}, {pipeline_mode = #tpu.pipeline_mode<synchronous>, transform_indices = @transform_14, window_bounds = array<i64: 1, 128>}, {pipeline_mode = #tpu.pipeline_mode<synchronous>, transform_indices = @transform_15, window_bounds = array<i64: 128, 32>}, {pipeline_mode = #tpu.pipeline_mode<synchronous>, transform_indices = @transform_16, window_bounds = array<i64: 1, 32>}, {pipeline_mode = #tpu.pipeline_mode<synchronous>, transform_indices = @transform_17, window_bounds = array<i64: 1, 32>}, {pipeline_mode = #tpu.pipeline_mode<synchronous>, transform_indices = @transform_18, window_bounds = array<i64: 1, 32>}, {pipeline_mode = #tpu.pipeline_mode<synchronous>, transform_indices = @transform_19, window_bounds = array<i64: 1, 32>}, {pipeline_mode = #tpu.pipeline_mode<synchronous>, transform_indices = @transform_20, window_bounds = array<i64: 1, 32>}, {transform_indices = @transform_21, window_bounds = array<i64: 1, 1, 15, 32>}]} {
    %c0 = arith.constant 0 : index
    %c0_0 = arith.constant 0 : index
    %c0_1 = arith.constant 0 : index
    %c0_2 = arith.constant 0 : index
    %0 = vector.load %arg2[%c0, %c0_0, %c0_1, %c0_2] : memref<1x1x15x32xf32, #tpu.memory_space<vmem>>, vector<1x1x15x32xf32>
    %1 = vector.shape_cast %0 : vector<1x1x15x32xf32> to vector<15x32xf32>
    %2 = vector.extract_strided_slice %1 {offsets = [3, 0], sizes = [12, 32], strides = [1, 1]} : vector<15x32xf32> to vector<12x32xf32>
    %3 = vector.extract_strided_slice %1 {offsets = [0, 0], sizes = [3, 32], strides = [1, 1]} : vector<15x32xf32> to vector<3x32xf32>
    %4 = vector.extract_strided_slice %1 {offsets = [3, 0], sizes = [12, 32], strides = [1, 1]} : vector<15x32xf32> to vector<12x32xf32>
    %5 = arith.truncf %3 : vector<3x32xf32> to vector<3x32xbf16>
    %c0_3 = arith.constant 0 : index
    %c0_4 = arith.constant 0 : index
    %6 = vector.load %arg3[%c0_3, %c0_4] : memref<32x32xbf16, #tpu.memory_space<vmem>>, vector<32x32xbf16>
    %cst = arith.constant dense<0.000000e+00> : vector<3x32xf32>
    %7 = tpu.matmul %5, %6, %cst {dimension_numbers = #tpu.dot_dimension_numbers<[1], [0], [0], [1], [0, 0, 1, 1], [], []>} : vector<3x32xbf16>, vector<32x32xbf16>, vector<3x32xf32> -> vector<3x32xf32>
    %c0_5 = arith.constant 0 : index
    %c0_6 = arith.constant 0 : index
    %8 = vector.load %arg6[%c0_5, %c0_6] : memref<1x32xf32, #tpu.memory_space<vmem>>, vector<1x32xf32>
    %9 = vector.broadcast %8 : vector<1x32xf32> to vector<3x32xf32>
    %10 = arith.addf %7, %9 : vector<3x32xf32>
    %11 = arith.truncf %4 : vector<12x32xf32> to vector<12x32xbf16>
    %c0_7 = arith.constant 0 : index
    %c0_8 = arith.constant 0 : index
    %12 = vector.load %arg4[%c0_7, %c0_8] : memref<32x64xbf16, #tpu.memory_space<vmem>>, vector<32x64xbf16>
    %cst_9 = arith.constant dense<0.000000e+00> : vector<12x64xf32>
    %13 = tpu.matmul %11, %12, %cst_9 {dimension_numbers = #tpu.dot_dimension_numbers<[1], [0], [0], [1], [0, 0, 1, 1], [], []>} : vector<12x32xbf16>, vector<32x64xbf16>, vector<12x64xf32> -> vector<12x64xf32>
    %c0_10 = arith.constant 0 : index
    %c0_11 = arith.constant 0 : index
    %14 = vector.load %arg7[%c0_10, %c0_11] : memref<1x64xf32, #tpu.memory_space<vmem>>, vector<1x64xf32>
    %15 = vector.broadcast %14 : vector<1x64xf32> to vector<12x64xf32>
    %16 = arith.addf %13, %15 : vector<12x64xf32>
    %cst_12 = arith.constant 0.353553385 : f32
    %17 = vector.broadcast %cst_12 : f32 to vector<3x32xf32>
    %18 = arith.mulf %10, %17 : vector<3x32xf32>
    %19 = vector.extract_strided_slice %16 {offsets = [0, 0], sizes = [12, 32], strides = [1, 1]} : vector<12x64xf32> to vector<12x32xf32>
    %20 = vector.extract_strided_slice %16 {offsets = [0, 32], sizes = [12, 32], strides = [1, 1]} : vector<12x64xf32> to vector<12x32xf32>
    %21 = vector.extract_strided_slice %18 {offsets = [0, 0], sizes = [3, 8], strides = [1, 1]} : vector<3x32xf32> to vector<3x8xf32>
    %22 = arith.truncf %21 : vector<3x8xf32> to vector<3x8xbf16>
    %23 = vector.extract_strided_slice %19 {offsets = [0, 0], sizes = [12, 8], strides = [1, 1]} : vector<12x32xf32> to vector<12x8xf32>
    %24 = arith.truncf %23 : vector<12x8xf32> to vector<12x8xbf16>
    %cst_13 = arith.constant dense<0.000000e+00> : vector<3x12xf32>
    %25 = tpu.matmul %22, %24, %cst_13 {dimension_numbers = #tpu.dot_dimension_numbers<[1], [1], [0], [0], [0, 0, 1, 0], [], []>} : vector<3x8xbf16>, vector<12x8xbf16>, vector<3x12xf32> -> vector<3x12xf32>
    %cst_14 = arith.constant dense<0xFF800000> : vector<3xf32>
    %26 = vector.multi_reduction <maximumf>, %25, %cst_14 [1] : vector<3x12xf32> to vector<3xf32>
    %27 = vector.shape_cast %26 : vector<3xf32> to vector<3x1xf32>
    %28 = vector.broadcast %27 : vector<3x1xf32> to vector<3x12xf32>
    %29 = arith.subf %25, %28 : vector<3x12xf32>
    %30 = math.exp %29 : vector<3x12xf32>
    %cst_15 = arith.constant dense<0.000000e+00> : vector<3xf32>
    %31 = vector.multi_reduction <add>, %30, %cst_15 [1] : vector<3x12xf32> to vector<3xf32>
    %32 = vector.shape_cast %31 : vector<3xf32> to vector<3x1xf32>
    %33 = tpu.reciprocal %32 {approx = true} : vector<3x1xf32> -> vector<3x1xf32>
    %34 = vector.broadcast %33 : vector<3x1xf32> to vector<3x12xf32>
    %35 = arith.mulf %30, %34 : vector<3x12xf32>
    %36 = arith.truncf %35 : vector<3x12xf32> to vector<3x12xbf16>
    %37 = vector.extract_strided_slice %20 {offsets = [0, 0], sizes = [12, 8], strides = [1, 1]} : vector<12x32xf32> to vector<12x8xf32>
    %38 = arith.truncf %37 : vector<12x8xf32> to vector<12x8xbf16>
    %cst_16 = arith.constant dense<0.000000e+00> : vector<3x8xf32>
    %39 = tpu.matmul %36, %38, %cst_16 {dimension_numbers = #tpu.dot_dimension_numbers<[1], [0], [0], [1], [0, 0, 1, 1], [], []>} : vector<3x12xbf16>, vector<12x8xbf16>, vector<3x8xf32> -> vector<3x8xf32>
    %40 = vector.extract_strided_slice %18 {offsets = [0, 8], sizes = [3, 8], strides = [1, 1]} : vector<3x32xf32> to vector<3x8xf32>
    %41 = arith.truncf %40 : vector<3x8xf32> to vector<3x8xbf16>
    %42 = vector.extract_strided_slice %19 {offsets = [0, 8], sizes = [12, 8], strides = [1, 1]} : vector<12x32xf32> to vector<12x8xf32>
    %43 = arith.truncf %42 : vector<12x8xf32> to vector<12x8xbf16>
    %cst_17 = arith.constant dense<0.000000e+00> : vector<3x12xf32>
    %44 = tpu.matmul %41, %43, %cst_17 {dimension_numbers = #tpu.dot_dimension_numbers<[1], [1], [0], [0], [0, 0, 1, 0], [], []>} : vector<3x8xbf16>, vector<12x8xbf16>, vector<3x12xf32> -> vector<3x12xf32>
    %cst_18 = arith.constant dense<0xFF800000> : vector<3xf32>
    %45 = vector.multi_reduction <maximumf>, %44, %cst_18 [1] : vector<3x12xf32> to vector<3xf32>
    %46 = vector.shape_cast %45 : vector<3xf32> to vector<3x1xf32>
    %47 = vector.broadcast %46 : vector<3x1xf32> to vector<3x12xf32>
    %48 = arith.subf %44, %47 : vector<3x12xf32>
    %49 = math.exp %48 : vector<3x12xf32>
    %cst_19 = arith.constant dense<0.000000e+00> : vector<3xf32>
    %50 = vector.multi_reduction <add>, %49, %cst_19 [1] : vector<3x12xf32> to vector<3xf32>
    %51 = vector.shape_cast %50 : vector<3xf32> to vector<3x1xf32>
    %52 = tpu.reciprocal %51 {approx = true} : vector<3x1xf32> -> vector<3x1xf32>
    %53 = vector.broadcast %52 : vector<3x1xf32> to vector<3x12xf32>
    %54 = arith.mulf %49, %53 : vector<3x12xf32>
    %55 = arith.truncf %54 : vector<3x12xf32> to vector<3x12xbf16>
    %56 = vector.extract_strided_slice %20 {offsets = [0, 8], sizes = [12, 8], strides = [1, 1]} : vector<12x32xf32> to vector<12x8xf32>
    %57 = arith.truncf %56 : vector<12x8xf32> to vector<12x8xbf16>
    %cst_20 = arith.constant dense<0.000000e+00> : vector<3x8xf32>
    %58 = tpu.matmul %55, %57, %cst_20 {dimension_numbers = #tpu.dot_dimension_numbers<[1], [0], [0], [1], [0, 0, 1, 1], [], []>} : vector<3x12xbf16>, vector<12x8xbf16>, vector<3x8xf32> -> vector<3x8xf32>
    %59 = vector.extract_strided_slice %18 {offsets = [0, 16], sizes = [3, 8], strides = [1, 1]} : vector<3x32xf32> to vector<3x8xf32>
    %60 = arith.truncf %59 : vector<3x8xf32> to vector<3x8xbf16>
    %61 = vector.extract_strided_slice %19 {offsets = [0, 16], sizes = [12, 8], strides = [1, 1]} : vector<12x32xf32> to vector<12x8xf32>
    %62 = arith.truncf %61 : vector<12x8xf32> to vector<12x8xbf16>
    %cst_21 = arith.constant dense<0.000000e+00> : vector<3x12xf32>
    %63 = tpu.matmul %60, %62, %cst_21 {dimension_numbers = #tpu.dot_dimension_numbers<[1], [1], [0], [0], [0, 0, 1, 0], [], []>} : vector<3x8xbf16>, vector<12x8xbf16>, vector<3x12xf32> -> vector<3x12xf32>
    %cst_22 = arith.constant dense<0xFF800000> : vector<3xf32>
    %64 = vector.multi_reduction <maximumf>, %63, %cst_22 [1] : vector<3x12xf32> to vector<3xf32>
    %65 = vector.shape_cast %64 : vector<3xf32> to vector<3x1xf32>
    %66 = vector.broadcast %65 : vector<3x1xf32> to vector<3x12xf32>
    %67 = arith.subf %63, %66 : vector<3x12xf32>
    %68 = math.exp %67 : vector<3x12xf32>
    %cst_23 = arith.constant dense<0.000000e+00> : vector<3xf32>
    %69 = vector.multi_reduction <add>, %68, %cst_23 [1] : vector<3x12xf32> to vector<3xf32>
    %70 = vector.shape_cast %69 : vector<3xf32> to vector<3x1xf32>
    %71 = tpu.reciprocal %70 {approx = true} : vector<3x1xf32> -> vector<3x1xf32>
    %72 = vector.broadcast %71 : vector<3x1xf32> to vector<3x12xf32>
    %73 = arith.mulf %68, %72 : vector<3x12xf32>
    %74 = arith.truncf %73 : vector<3x12xf32> to vector<3x12xbf16>
    %75 = vector.extract_strided_slice %20 {offsets = [0, 16], sizes = [12, 8], strides = [1, 1]} : vector<12x32xf32> to vector<12x8xf32>
    %76 = arith.truncf %75 : vector<12x8xf32> to vector<12x8xbf16>
    %cst_24 = arith.constant dense<0.000000e+00> : vector<3x8xf32>
    %77 = tpu.matmul %74, %76, %cst_24 {dimension_numbers = #tpu.dot_dimension_numbers<[1], [0], [0], [1], [0, 0, 1, 1], [], []>} : vector<3x12xbf16>, vector<12x8xbf16>, vector<3x8xf32> -> vector<3x8xf32>
    %78 = vector.extract_strided_slice %18 {offsets = [0, 24], sizes = [3, 8], strides = [1, 1]} : vector<3x32xf32> to vector<3x8xf32>
    %79 = arith.truncf %78 : vector<3x8xf32> to vector<3x8xbf16>
    %80 = vector.extract_strided_slice %19 {offsets = [0, 24], sizes = [12, 8], strides = [1, 1]} : vector<12x32xf32> to vector<12x8xf32>
    %81 = arith.truncf %80 : vector<12x8xf32> to vector<12x8xbf16>
    %cst_25 = arith.constant dense<0.000000e+00> : vector<3x12xf32>
    %82 = tpu.matmul %79, %81, %cst_25 {dimension_numbers = #tpu.dot_dimension_numbers<[1], [1], [0], [0], [0, 0, 1, 0], [], []>} : vector<3x8xbf16>, vector<12x8xbf16>, vector<3x12xf32> -> vector<3x12xf32>
    %cst_26 = arith.constant dense<0xFF800000> : vector<3xf32>
    %83 = vector.multi_reduction <maximumf>, %82, %cst_26 [1] : vector<3x12xf32> to vector<3xf32>
    %84 = vector.shape_cast %83 : vector<3xf32> to vector<3x1xf32>
    %85 = vector.broadcast %84 : vector<3x1xf32> to vector<3x12xf32>
    %86 = arith.subf %82, %85 : vector<3x12xf32>
    %87 = math.exp %86 : vector<3x12xf32>
    %cst_27 = arith.constant dense<0.000000e+00> : vector<3xf32>
    %88 = vector.multi_reduction <add>, %87, %cst_27 [1] : vector<3x12xf32> to vector<3xf32>
    %89 = vector.shape_cast %88 : vector<3xf32> to vector<3x1xf32>
    %90 = tpu.reciprocal %89 {approx = true} : vector<3x1xf32> -> vector<3x1xf32>
    %91 = vector.broadcast %90 : vector<3x1xf32> to vector<3x12xf32>
    %92 = arith.mulf %87, %91 : vector<3x12xf32>
    %93 = arith.truncf %92 : vector<3x12xf32> to vector<3x12xbf16>
    %94 = vector.extract_strided_slice %20 {offsets = [0, 24], sizes = [12, 8], strides = [1, 1]} : vector<12x32xf32> to vector<12x8xf32>
    %95 = arith.truncf %94 : vector<12x8xf32> to vector<12x8xbf16>
    %cst_28 = arith.constant dense<0.000000e+00> : vector<3x8xf32>
    %96 = tpu.matmul %93, %95, %cst_28 {dimension_numbers = #tpu.dot_dimension_numbers<[1], [0], [0], [1], [0, 0, 1, 1], [], []>} : vector<3x12xbf16>, vector<12x8xbf16>, vector<3x8xf32> -> vector<3x8xf32>
    %97 = tpu.concatenate %39, %58, %77, %96 in 1 : vector<3x8xf32>, vector<3x8xf32>, vector<3x8xf32>, vector<3x8xf32> -> vector<3x32xf32>
    %98 = arith.truncf %97 : vector<3x32xf32> to vector<3x32xbf16>
    %c0_29 = arith.constant 0 : index
    %c0_30 = arith.constant 0 : index
    %99 = vector.load %arg5[%c0_29, %c0_30] : memref<32x32xbf16, #tpu.memory_space<vmem>>, vector<32x32xbf16>
    %cst_31 = arith.constant dense<0.000000e+00> : vector<3x32xf32>
    %100 = tpu.matmul %98, %99, %cst_31 {dimension_numbers = #tpu.dot_dimension_numbers<[1], [0], [0], [1], [0, 0, 1, 1], [], []>} : vector<3x32xbf16>, vector<32x32xbf16>, vector<3x32xf32> -> vector<3x32xf32>
    %c0_32 = arith.constant 0 : index
    %c0_33 = arith.constant 0 : index
    %101 = vector.load %arg8[%c0_32, %c0_33] : memref<1x32xf32, #tpu.memory_space<vmem>>, vector<1x32xf32>
    %102 = vector.broadcast %101 : vector<1x32xf32> to vector<3x32xf32>
    %103 = arith.addf %100, %102 : vector<3x32xf32>
    %c0_34 = arith.constant 0 : index
    %c0_35 = arith.constant 0 : index
    %104 = vector.load %arg24[%c0_34, %c0_35] : memref<15x32xf32, #tpu.memory_space<vmem>>, vector<15x32xf32>
    tpu.vector_store %arg24[%c0_34, %c0_35], %1 {strides = array<i32>} : memref<15x32xf32, #tpu.memory_space<vmem>>, vector<15x32xf32>,
    %c0_36 = arith.constant 0 : index
    %c0_37 = arith.constant 0 : index
    %105 = vector.load %arg24[%c0_36, %c0_37] : memref<15x32xf32, #tpu.memory_space<vmem>>, vector<3x32xf32>
    tpu.vector_store %arg24[%c0_36, %c0_37], %103 {strides = array<i32>} : memref<15x32xf32, #tpu.memory_space<vmem>>, vector<3x32xf32>,
    %c0_38 = arith.constant 0 : index
    %c0_39 = arith.constant 0 : index
    %106 = vector.load %arg24[%c0_38, %c0_39] : memref<15x32xf32, #tpu.memory_space<vmem>>, vector<15x32xf32>
    %107 = arith.truncf %2 : vector<12x32xf32> to vector<12x32xbf16>
    %c0_40 = arith.constant 0 : index
    %c0_41 = arith.constant 0 : index
    %108 = vector.load %arg9[%c0_40, %c0_41] : memref<32x32xbf16, #tpu.memory_space<vmem>>, vector<32x32xbf16>
    %cst_42 = arith.constant dense<0.000000e+00> : vector<12x32xf32>
    %109 = tpu.matmul %107, %108, %cst_42 {dimension_numbers = #tpu.dot_dimension_numbers<[1], [0], [0], [1], [0, 0, 1, 1], [], []>} : vector<12x32xbf16>, vector<32x32xbf16>, vector<12x32xf32> -> vector<12x32xf32>
    %c0_43 = arith.constant 0 : index
    %c0_44 = arith.constant 0 : index
    %110 = vector.load %arg12[%c0_43, %c0_44] : memref<1x32xf32, #tpu.memory_space<vmem>>, vector<1x32xf32>
    %111 = vector.broadcast %110 : vector<1x32xf32> to vector<12x32xf32>
    %112 = arith.addf %109, %111 : vector<12x32xf32>
    %113 = arith.truncf %106 : vector<15x32xf32> to vector<15x32xbf16>
    %c0_45 = arith.constant 0 : index
    %c0_46 = arith.constant 0 : index
    %114 = vector.load %arg10[%c0_45, %c0_46] : memref<32x64xbf16, #tpu.memory_space<vmem>>, vector<32x64xbf16>
    %cst_47 = arith.constant dense<0.000000e+00> : vector<15x64xf32>
    %115 = tpu.matmul %113, %114, %cst_47 {dimension_numbers = #tpu.dot_dimension_numbers<[1], [0], [0], [1], [0, 0, 1, 1], [], []>} : vector<15x32xbf16>, vector<32x64xbf16>, vector<15x64xf32> -> vector<15x64xf32>
    %c0_48 = arith.constant 0 : index
    %c0_49 = arith.constant 0 : index
    %116 = vector.load %arg13[%c0_48, %c0_49] : memref<1x64xf32, #tpu.memory_space<vmem>>, vector<1x64xf32>
    %117 = vector.broadcast %116 : vector<1x64xf32> to vector<15x64xf32>
    %118 = arith.addf %115, %117 : vector<15x64xf32>
    %cst_50 = arith.constant 0.353553385 : f32
    %119 = vector.broadcast %cst_50 : f32 to vector<12x32xf32>
    %120 = arith.mulf %112, %119 : vector<12x32xf32>
    %121 = vector.extract_strided_slice %118 {offsets = [0, 0], sizes = [15, 32], strides = [1, 1]} : vector<15x64xf32> to vector<15x32xf32>
    %122 = vector.extract_strided_slice %118 {offsets = [0, 32], sizes = [15, 32], strides = [1, 1]} : vector<15x64xf32> to vector<15x32xf32>
    %123 = vector.extract_strided_slice %120 {offsets = [0, 0], sizes = [12, 8], strides = [1, 1]} : vector<12x32xf32> to vector<12x8xf32>
    %124 = arith.truncf %123 : vector<12x8xf32> to vector<12x8xbf16>
    %125 = vector.extract_strided_slice %121 {offsets = [0, 0], sizes = [15, 8], strides = [1, 1]} : vector<15x32xf32> to vector<15x8xf32>
    %126 = arith.truncf %125 : vector<15x8xf32> to vector<15x8xbf16>
    %cst_51 = arith.constant dense<0.000000e+00> : vector<12x15xf32>
    %127 = tpu.matmul %124, %126, %cst_51 {dimension_numbers = #tpu.dot_dimension_numbers<[1], [1], [0], [0], [0, 0, 1, 0], [], []>} : vector<12x8xbf16>, vector<15x8xbf16>, vector<12x15xf32> -> vector<12x15xf32>
    %cst_52 = arith.constant dense<0xFF800000> : vector<12xf32>
    %128 = vector.multi_reduction <maximumf>, %127, %cst_52 [1] : vector<12x15xf32> to vector<12xf32>
    %129 = vector.shape_cast %128 : vector<12xf32> to vector<12x1xf32>
    %130 = vector.broadcast %129 : vector<12x1xf32> to vector<12x15xf32>
    %131 = arith.subf %127, %130 : vector<12x15xf32>
    %132 = math.exp %131 : vector<12x15xf32>
    %cst_53 = arith.constant dense<0.000000e+00> : vector<12xf32>
    %133 = vector.multi_reduction <add>, %132, %cst_53 [1] : vector<12x15xf32> to vector<12xf32>
    %134 = vector.shape_cast %133 : vector<12xf32> to vector<12x1xf32>
    %135 = tpu.reciprocal %134 {approx = true} : vector<12x1xf32> -> vector<12x1xf32>
    %136 = vector.broadcast %135 : vector<12x1xf32> to vector<12x15xf32>
    %137 = arith.mulf %132, %136 : vector<12x15xf32>
    %138 = arith.truncf %137 : vector<12x15xf32> to vector<12x15xbf16>
    %139 = vector.extract_strided_slice %122 {offsets = [0, 0], sizes = [15, 8], strides = [1, 1]} : vector<15x32xf32> to vector<15x8xf32>
    %140 = arith.truncf %139 : vector<15x8xf32> to vector<15x8xbf16>
    %cst_54 = arith.constant dense<0.000000e+00> : vector<12x8xf32>
    %141 = tpu.matmul %138, %140, %cst_54 {dimension_numbers = #tpu.dot_dimension_numbers<[1], [0], [0], [1], [0, 0, 1, 1], [], []>} : vector<12x15xbf16>, vector<15x8xbf16>, vector<12x8xf32> -> vector<12x8xf32>
    %142 = vector.extract_strided_slice %120 {offsets = [0, 8], sizes = [12, 8], strides = [1, 1]} : vector<12x32xf32> to vector<12x8xf32>
    %143 = arith.truncf %142 : vector<12x8xf32> to vector<12x8xbf16>
    %144 = vector.extract_strided_slice %121 {offsets = [0, 8], sizes = [15, 8], strides = [1, 1]} : vector<15x32xf32> to vector<15x8xf32>
    %145 = arith.truncf %144 : vector<15x8xf32> to vector<15x8xbf16>
    %cst_55 = arith.constant dense<0.000000e+00> : vector<12x15xf32>
    %146 = tpu.matmul %143, %145, %cst_55 {dimension_numbers = #tpu.dot_dimension_numbers<[1], [1], [0], [0], [0, 0, 1, 0], [], []>} : vector<12x8xbf16>, vector<15x8xbf16>, vector<12x15xf32> -> vector<12x15xf32>
    %cst_56 = arith.constant dense<0xFF800000> : vector<12xf32>
    %147 = vector.multi_reduction <maximumf>, %146, %cst_56 [1] : vector<12x15xf32> to vector<12xf32>
    %148 = vector.shape_cast %147 : vector<12xf32> to vector<12x1xf32>
    %149 = vector.broadcast %148 : vector<12x1xf32> to vector<12x15xf32>
    %150 = arith.subf %146, %149 : vector<12x15xf32>
    %151 = math.exp %150 : vector<12x15xf32>
    %cst_57 = arith.constant dense<0.000000e+00> : vector<12xf32>
    %152 = vector.multi_reduction <add>, %151, %cst_57 [1] : vector<12x15xf32> to vector<12xf32>
    %153 = vector.shape_cast %152 : vector<12xf32> to vector<12x1xf32>
    %154 = tpu.reciprocal %153 {approx = true} : vector<12x1xf32> -> vector<12x1xf32>
    %155 = vector.broadcast %154 : vector<12x1xf32> to vector<12x15xf32>
    %156 = arith.mulf %151, %155 : vector<12x15xf32>
    %157 = arith.truncf %156 : vector<12x15xf32> to vector<12x15xbf16>
    %158 = vector.extract_strided_slice %122 {offsets = [0, 8], sizes = [15, 8], strides = [1, 1]} : vector<15x32xf32> to vector<15x8xf32>
    %159 = arith.truncf %158 : vector<15x8xf32> to vector<15x8xbf16>
    %cst_58 = arith.constant dense<0.000000e+00> : vector<12x8xf32>
    %160 = tpu.matmul %157, %159, %cst_58 {dimension_numbers = #tpu.dot_dimension_numbers<[1], [0], [0], [1], [0, 0, 1, 1], [], []>} : vector<12x15xbf16>, vector<15x8xbf16>, vector<12x8xf32> -> vector<12x8xf32>
    %161 = vector.extract_strided_slice %120 {offsets = [0, 16], sizes = [12, 8], strides = [1, 1]} : vector<12x32xf32> to vector<12x8xf32>
    %162 = arith.truncf %161 : vector<12x8xf32> to vector<12x8xbf16>
    %163 = vector.extract_strided_slice %121 {offsets = [0, 16], sizes = [15, 8], strides = [1, 1]} : vector<15x32xf32> to vector<15x8xf32>
    %164 = arith.truncf %163 : vector<15x8xf32> to vector<15x8xbf16>
    %cst_59 = arith.constant dense<0.000000e+00> : vector<12x15xf32>
    %165 = tpu.matmul %162, %164, %cst_59 {dimension_numbers = #tpu.dot_dimension_numbers<[1], [1], [0], [0], [0, 0, 1, 0], [], []>} : vector<12x8xbf16>, vector<15x8xbf16>, vector<12x15xf32> -> vector<12x15xf32>
    %cst_60 = arith.constant dense<0xFF800000> : vector<12xf32>
    %166 = vector.multi_reduction <maximumf>, %165, %cst_60 [1] : vector<12x15xf32> to vector<12xf32>
    %167 = vector.shape_cast %166 : vector<12xf32> to vector<12x1xf32>
    %168 = vector.broadcast %167 : vector<12x1xf32> to vector<12x15xf32>
    %169 = arith.subf %165, %168 : vector<12x15xf32>
    %170 = math.exp %169 : vector<12x15xf32>
    %cst_61 = arith.constant dense<0.000000e+00> : vector<12xf32>
    %171 = vector.multi_reduction <add>, %170, %cst_61 [1] : vector<12x15xf32> to vector<12xf32>
    %172 = vector.shape_cast %171 : vector<12xf32> to vector<12x1xf32>
    %173 = tpu.reciprocal %172 {approx = true} : vector<12x1xf32> -> vector<12x1xf32>
    %174 = vector.broadcast %173 : vector<12x1xf32> to vector<12x15xf32>
    %175 = arith.mulf %170, %174 : vector<12x15xf32>
    %176 = arith.truncf %175 : vector<12x15xf32> to vector<12x15xbf16>
    %177 = vector.extract_strided_slice %122 {offsets = [0, 16], sizes = [15, 8], strides = [1, 1]} : vector<15x32xf32> to vector<15x8xf32>
    %178 = arith.truncf %177 : vector<15x8xf32> to vector<15x8xbf16>
    %cst_62 = arith.constant dense<0.000000e+00> : vector<12x8xf32>
    %179 = tpu.matmul %176, %178, %cst_62 {dimension_numbers = #tpu.dot_dimension_numbers<[1], [0], [0], [1], [0, 0, 1, 1], [], []>} : vector<12x15xbf16>, vector<15x8xbf16>, vector<12x8xf32> -> vector<12x8xf32>
    %180 = vector.extract_strided_slice %120 {offsets = [0, 24], sizes = [12, 8], strides = [1, 1]} : vector<12x32xf32> to vector<12x8xf32>
    %181 = arith.truncf %180 : vector<12x8xf32> to vector<12x8xbf16>
    %182 = vector.extract_strided_slice %121 {offsets = [0, 24], sizes = [15, 8], strides = [1, 1]} : vector<15x32xf32> to vector<15x8xf32>
    %183 = arith.truncf %182 : vector<15x8xf32> to vector<15x8xbf16>
    %cst_63 = arith.constant dense<0.000000e+00> : vector<12x15xf32>
    %184 = tpu.matmul %181, %183, %cst_63 {dimension_numbers = #tpu.dot_dimension_numbers<[1], [1], [0], [0], [0, 0, 1, 0], [], []>} : vector<12x8xbf16>, vector<15x8xbf16>, vector<12x15xf32> -> vector<12x15xf32>
    %cst_64 = arith.constant dense<0xFF800000> : vector<12xf32>
    %185 = vector.multi_reduction <maximumf>, %184, %cst_64 [1] : vector<12x15xf32> to vector<12xf32>
    %186 = vector.shape_cast %185 : vector<12xf32> to vector<12x1xf32>
    %187 = vector.broadcast %186 : vector<12x1xf32> to vector<12x15xf32>
    %188 = arith.subf %184, %187 : vector<12x15xf32>
    %189 = math.exp %188 : vector<12x15xf32>
    %cst_65 = arith.constant dense<0.000000e+00> : vector<12xf32>
    %190 = vector.multi_reduction <add>, %189, %cst_65 [1] : vector<12x15xf32> to vector<12xf32>
    %191 = vector.shape_cast %190 : vector<12xf32> to vector<12x1xf32>
    %192 = tpu.reciprocal %191 {approx = true} : vector<12x1xf32> -> vector<12x1xf32>
    %193 = vector.broadcast %192 : vector<12x1xf32> to vector<12x15xf32>
    %194 = arith.mulf %189, %193 : vector<12x15xf32>
    %195 = arith.truncf %194 : vector<12x15xf32> to vector<12x15xbf16>
    %196 = vector.extract_strided_slice %122 {offsets = [0, 24], sizes = [15, 8], strides = [1, 1]} : vector<15x32xf32> to vector<15x8xf32>
    %197 = arith.truncf %196 : vector<15x8xf32> to vector<15x8xbf16>
    %cst_66 = arith.constant dense<0.000000e+00> : vector<12x8xf32>
    %198 = tpu.matmul %195, %197, %cst_66 {dimension_numbers = #tpu.dot_dimension_numbers<[1], [0], [0], [1], [0, 0, 1, 1], [], []>} : vector<12x15xbf16>, vector<15x8xbf16>, vector<12x8xf32> -> vector<12x8xf32>
    %199 = tpu.concatenate %141, %160, %179, %198 in 1 : vector<12x8xf32>, vector<12x8xf32>, vector<12x8xf32>, vector<12x8xf32> -> vector<12x32xf32>
    %200 = arith.truncf %199 : vector<12x32xf32> to vector<12x32xbf16>
    %c0_67 = arith.constant 0 : index
    %c0_68 = arith.constant 0 : index
    %201 = vector.load %arg11[%c0_67, %c0_68] : memref<32x32xbf16, #tpu.memory_space<vmem>>, vector<32x32xbf16>
    %cst_69 = arith.constant dense<0.000000e+00> : vector<12x32xf32>
    %202 = tpu.matmul %200, %201, %cst_69 {dimension_numbers = #tpu.dot_dimension_numbers<[1], [0], [0], [1], [0, 0, 1, 1], [], []>} : vector<12x32xbf16>, vector<32x32xbf16>, vector<12x32xf32> -> vector<12x32xf32>
    %c0_70 = arith.constant 0 : index
    %c0_71 = arith.constant 0 : index
    %203 = vector.load %arg14[%c0_70, %c0_71] : memref<1x32xf32, #tpu.memory_space<vmem>>, vector<1x32xf32>
    %204 = vector.broadcast %203 : vector<1x32xf32> to vector<12x32xf32>
    %205 = arith.addf %202, %204 : vector<12x32xf32>
    %206 = arith.addf %2, %205 : vector<12x32xf32>
    %c0_72 = arith.constant 0 : index
    %c0_73 = arith.constant 0 : index
    %207 = vector.load %arg19[%c0_72, %c0_73] : memref<1x32xf32, #tpu.memory_space<vmem>>, vector<1x32xf32>
    %c0_74 = arith.constant 0 : index
    %c0_75 = arith.constant 0 : index
    %208 = vector.load %arg20[%c0_74, %c0_75] : memref<1x32xf32, #tpu.memory_space<vmem>>, vector<1x32xf32>
    %cst_76 = arith.constant dense<0.000000e+00> : vector<12xf32>
    %209 = vector.multi_reduction <add>, %206, %cst_76 [1] : vector<12x32xf32> to vector<12xf32>
    %210 = vector.shape_cast %209 : vector<12xf32> to vector<12x1xf32>
    %cst_77 = arith.constant 3.200000e+01 : f32
    %211 = vector.broadcast %cst_77 : f32 to vector<12x1xf32>
    %212 = arith.divf %210, %211 : vector<12x1xf32>
    %213 = vector.broadcast %212 : vector<12x1xf32> to vector<12x32xf32>
    %214 = arith.subf %206, %213 : vector<12x32xf32>
    %215 = arith.mulf %214, %214 : vector<12x32xf32>
    %cst_78 = arith.constant dense<0.000000e+00> : vector<12xf32>
    %216 = vector.multi_reduction <add>, %215, %cst_78 [1] : vector<12x32xf32> to vector<12xf32>
    %217 = vector.shape_cast %216 : vector<12xf32> to vector<12x1xf32>
    %cst_79 = arith.constant 3.200000e+01 : f32
    %218 = vector.broadcast %cst_79 : f32 to vector<12x1xf32>
    %219 = arith.divf %217, %218 : vector<12x1xf32>
    %cst_80 = arith.constant 9.99999974E-6 : f32
    %220 = vector.broadcast %cst_80 : f32 to vector<12x1xf32>
    %221 = arith.addf %219, %220 : vector<12x1xf32>
    %222 = math.rsqrt %221 : vector<12x1xf32>
    %223 = vector.broadcast %222 : vector<12x1xf32> to vector<12x32xf32>
    %224 = arith.mulf %214, %223 : vector<12x32xf32>
    %225 = vector.broadcast %207 : vector<1x32xf32> to vector<12x32xf32>
    %226 = arith.mulf %224, %225 : vector<12x32xf32>
    %227 = vector.broadcast %208 : vector<1x32xf32> to vector<12x32xf32>
    %228 = arith.addf %226, %227 : vector<12x32xf32>
    %229 = arith.truncf %228 : vector<12x32xf32> to vector<12x32xbf16>
    %c0_81 = arith.constant 0 : index
    %c0_82 = arith.constant 0 : index
    %230 = vector.load %arg15[%c0_81, %c0_82] : memref<32x128xbf16, #tpu.memory_space<vmem>>, vector<32x128xbf16>
    %cst_83 = arith.constant dense<0.000000e+00> : vector<12x128xf32>
    %231 = tpu.matmul %229, %230, %cst_83 {dimension_numbers = #tpu.dot_dimension_numbers<[1], [0], [0], [1], [0, 0, 1, 1], [], []>} : vector<12x32xbf16>, vector<32x128xbf16>, vector<12x128xf32> -> vector<12x128xf32>
    %c0_84 = arith.constant 0 : index
    %c0_85 = arith.constant 0 : index
    %232 = vector.load %arg16[%c0_84, %c0_85] : memref<1x128xf32, #tpu.memory_space<vmem>>, vector<1x128xf32>
    %233 = vector.broadcast %232 : vector<1x128xf32> to vector<12x128xf32>
    %234 = arith.addf %231, %233 : vector<12x128xf32>
    %cst_86 = arith.constant 0.000000e+00 : f32
    %235 = vector.broadcast %cst_86 : f32 to vector<12x128xf32>
    %236 = arith.maximumf %234, %235 : vector<12x128xf32>
    %237 = arith.truncf %236 : vector<12x128xf32> to vector<12x128xbf16>
    %c0_87 = arith.constant 0 : index
    %c0_88 = arith.constant 0 : index
    %238 = vector.load %arg17[%c0_87, %c0_88] : memref<128x32xbf16, #tpu.memory_space<vmem>>, vector<128x32xbf16>
    %cst_89 = arith.constant dense<0.000000e+00> : vector<12x32xf32>
    %239 = tpu.matmul %237, %238, %cst_89 {dimension_numbers = #tpu.dot_dimension_numbers<[1], [0], [0], [1], [0, 0, 1, 1], [], []>} : vector<12x128xbf16>, vector<128x32xbf16>, vector<12x32xf32> -> vector<12x32xf32>
    %c0_90 = arith.constant 0 : index
    %c0_91 = arith.constant 0 : index
    %240 = vector.load %arg18[%c0_90, %c0_91] : memref<1x32xf32, #tpu.memory_space<vmem>>, vector<1x32xf32>
    %241 = vector.broadcast %240 : vector<1x32xf32> to vector<12x32xf32>
    %242 = arith.addf %239, %241 : vector<12x32xf32>
    %243 = arith.addf %228, %242 : vector<12x32xf32>
    %c0_92 = arith.constant 0 : index
    %c0_93 = arith.constant 0 : index
    %244 = vector.load %arg21[%c0_92, %c0_93] : memref<1x32xf32, #tpu.memory_space<vmem>>, vector<1x32xf32>
    %c0_94 = arith.constant 0 : index
    %c0_95 = arith.constant 0 : index
    %245 = vector.load %arg22[%c0_94, %c0_95] : memref<1x32xf32, #tpu.memory_space<vmem>>, vector<1x32xf32>
    %cst_96 = arith.constant dense<0.000000e+00> : vector<12xf32>
    %246 = vector.multi_reduction <add>, %243, %cst_96 [1] : vector<12x32xf32> to vector<12xf32>
    %247 = vector.shape_cast %246 : vector<12xf32> to vector<12x1xf32>
    %cst_97 = arith.constant 3.200000e+01 : f32
    %248 = vector.broadcast %cst_97 : f32 to vector<12x1xf32>
    %249 = arith.divf %247, %248 : vector<12x1xf32>
    %250 = vector.broadcast %249 : vector<12x1xf32> to vector<12x32xf32>
    %251 = arith.subf %243, %250 : vector<12x32xf32>
    %252 = arith.mulf %251, %251 : vector<12x32xf32>
    %cst_98 = arith.constant dense<0.000000e+00> : vector<12xf32>
    %253 = vector.multi_reduction <add>, %252, %cst_98 [1] : vector<12x32xf32> to vector<12xf32>
    %254 = vector.shape_cast %253 : vector<12xf32> to vector<12x1xf32>
    %cst_99 = arith.constant 3.200000e+01 : f32
    %255 = vector.broadcast %cst_99 : f32 to vector<12x1xf32>
    %256 = arith.divf %254, %255 : vector<12x1xf32>
    %cst_100 = arith.constant 9.99999974E-6 : f32
    %257 = vector.broadcast %cst_100 : f32 to vector<12x1xf32>
    %258 = arith.addf %256, %257 : vector<12x1xf32>
    %259 = math.rsqrt %258 : vector<12x1xf32>
    %260 = vector.broadcast %259 : vector<12x1xf32> to vector<12x32xf32>
    %261 = arith.mulf %251, %260 : vector<12x32xf32>
    %262 = vector.broadcast %244 : vector<1x32xf32> to vector<12x32xf32>
    %263 = arith.mulf %261, %262 : vector<12x32xf32>
    %264 = vector.broadcast %245 : vector<1x32xf32> to vector<12x32xf32>
    %265 = arith.addf %263, %264 : vector<12x32xf32>
    %c0_101 = arith.constant 0 : index
    %c0_102 = arith.constant 0 : index
    %c0_103 = arith.constant 0 : index
    %c0_104 = arith.constant 0 : index
    %266 = vector.load %arg23[%c0_101, %c0_102, %c0_103, %c0_104] : memref<1x1x15x32xf32, #tpu.memory_space<vmem>>, vector<1x1x3x32xf32>
    %267 = vector.shape_cast %266 : vector<1x1x3x32xf32> to vector<3x32xf32>
    %268 = vector.shape_cast %103 : vector<3x32xf32> to vector<1x1x3x32xf32>
    tpu.vector_store %arg23[%c0_101, %c0_102, %c0_103, %c0_104], %268 {strides = array<i32>} : memref<1x1x15x32xf32, #tpu.memory_space<vmem>>, vector<1x1x3x32xf32>,
    %c0_105 = arith.constant 0 : index
    %c0_106 = arith.constant 0 : index
    %c3 = arith.constant 3 : index
    %c0_107 = arith.constant 0 : index
    %269 = vector.load %arg23[%c0_105, %c0_106, %c3, %c0_107] : memref<1x1x15x32xf32, #tpu.memory_space<vmem>>, vector<1x1x12x32xf32>
    %270 = vector.shape_cast %269 : vector<1x1x12x32xf32> to vector<12x32xf32>
    %271 = vector.shape_cast %265 : vector<12x32xf32> to vector<1x1x12x32xf32>
    tpu.vector_store %arg23[%c0_105, %c0_106, %c3, %c0_107], %271 {strides = array<i32>} : memref<1x1x15x32xf32, #tpu.memory_space<vmem>>, vector<1x1x12x32xf32>,
    return
  }
  func.func @transform_0(%arg0: i32, %arg1: i32) -> (i32, i32, i32, i32) {
    %c0_i32 = arith.constant 0 : i32
    %c0_i32_0 = arith.constant 0 : i32
    %c0_i32_1 = arith.constant 0 : i32
    return %arg0, %arg1, %c0_i32, %c0_i32_0 : i32, i32, i32, i32
  }
  func.func @transform_1(%arg0: i32, %arg1: i32) -> (i32, i32) {
    %c0_i32 = arith.constant 0 : i32
    %c0_i32_0 = arith.constant 0 : i32
    %c0_i32_1 = arith.constant 0 : i32
    return %c0_i32, %c0_i32_0 : i32, i32
  }
  func.func @transform_2(%arg0: i32, %arg1: i32) -> (i32, i32) {
    %c0_i32 = arith.constant 0 : i32
    %c0_i32_0 = arith.constant 0 : i32
    %c0_i32_1 = arith.constant 0 : i32
    return %c0_i32, %c0_i32_0 : i32, i32
  }
  func.func @transform_3(%arg0: i32, %arg1: i32) -> (i32, i32) {
    %c0_i32 = arith.constant 0 : i32
    %c0_i32_0 = arith.constant 0 : i32
    %c0_i32_1 = arith.constant 0 : i32
    return %c0_i32, %c0_i32_0 : i32, i32
  }
  func.func @transform_4(%arg0: i32, %arg1: i32) -> (i32, i32) {
    %c0_i32 = arith.constant 0 : i32
    %c0_i32_0 = arith.constant 0 : i32
    %c0_i32_1 = arith.constant 0 : i32
    return %c0_i32, %c0_i32_0 : i32, i32
  }
  func.func @transform_5(%arg0: i32, %arg1: i32) -> (i32, i32) {
    %c0_i32 = arith.constant 0 : i32
    %c0_i32_0 = arith.constant 0 : i32
    %c0_i32_1 = arith.constant 0 : i32
    return %c0_i32, %c0_i32_0 : i32, i32
  }
  func.func @transform_6(%arg0: i32, %arg1: i32) -> (i32, i32) {
    %c0_i32 = arith.constant 0 : i32
    %c0_i32_0 = arith.constant 0 : i32
    %c0_i32_1 = arith.constant 0 : i32
    return %c0_i32, %c0_i32_0 : i32, i32
  }
  func.func @transform_7(%arg0: i32, %arg1: i32) -> (i32, i32) {
    %c0_i32 = arith.constant 0 : i32
    %c0_i32_0 = arith.constant 0 : i32
    %c0_i32_1 = arith.constant 0 : i32
    return %c0_i32, %c0_i32_0 : i32, i32
  }
  func.func @transform_8(%arg0: i32, %arg1: i32) -> (i32, i32) {
    %c0_i32 = arith.constant 0 : i32
    %c0_i32_0 = arith.constant 0 : i32
    %c0_i32_1 = arith.constant 0 : i32
    return %c0_i32, %c0_i32_0 : i32, i32
  }
  func.func @transform_9(%arg0: i32, %arg1: i32) -> (i32, i32) {
    %c0_i32 = arith.constant 0 : i32
    %c0_i32_0 = arith.constant 0 : i32
    %c0_i32_1 = arith.constant 0 : i32
    return %c0_i32, %c0_i32_0 : i32, i32
  }
  func.func @transform_10(%arg0: i32, %arg1: i32) -> (i32, i32) {
    %c0_i32 = arith.constant 0 : i32
    %c0_i32_0 = arith.constant 0 : i32
    %c0_i32_1 = arith.constant 0 : i32
    return %c0_i32, %c0_i32_0 : i32, i32
  }
  func.func @transform_11(%arg0: i32, %arg1: i32) -> (i32, i32) {
    %c0_i32 = arith.constant 0 : i32
    %c0_i32_0 = arith.constant 0 : i32
    %c0_i32_1 = arith.constant 0 : i32
    return %c0_i32, %c0_i32_0 : i32, i32
  }
  func.func @transform_12(%arg0: i32, %arg1: i32) -> (i32, i32) {
    %c0_i32 = arith.constant 0 : i32
    %c0_i32_0 = arith.constant 0 : i32
    %c0_i32_1 = arith.constant 0 : i32
    return %c0_i32, %c0_i32_0 : i32, i32
  }
  func.func @transform_13(%arg0: i32, %arg1: i32) -> (i32, i32) {
    %c0_i32 = arith.constant 0 : i32
    %c0_i32_0 = arith.constant 0 : i32
    %c0_i32_1 = arith.constant 0 : i32
    return %c0_i32, %c0_i32_0 : i32, i32
  }
  func.func @transform_14(%arg0: i32, %arg1: i32) -> (i32, i32) {
    %c0_i32 = arith.constant 0 : i32
    %c0_i32_0 = arith.constant 0 : i32
    %c0_i32_1 = arith.constant 0 : i32
    return %c0_i32, %c0_i32_0 : i32, i32
  }
  func.func @transform_15(%arg0: i32, %arg1: i32) -> (i32, i32) {
    %c0_i32 = arith.constant 0 : i32
    %c0_i32_0 = arith.constant 0 : i32
    %c0_i32_1 = arith.constant 0 : i32
    return %c0_i32, %c0_i32_0 : i32, i32
  }
  func.func @transform_16(%arg0: i32, %arg1: i32) -> (i32, i32) {
    %c0_i32 = arith.constant 0 : i32
    %c0_i32_0 = arith.constant 0 : i32
    %c0_i32_1 = arith.constant 0 : i32
    return %c0_i32, %c0_i32_0 : i32, i32
  }
  func.func @transform_17(%arg0: i32, %arg1: i32) -> (i32, i32) {
    %c0_i32 = arith.constant 0 : i32
    %c0_i32_0 = arith.constant 0 : i32
    %c0_i32_1 = arith.constant 0 : i32
    return %c0_i32, %c0_i32_0 : i32, i32
  }
  func.func @transform_18(%arg0: i32, %arg1: i32) -> (i32, i32) {
    %c0_i32 = arith.constant 0 : i32
    %c0_i32_0 = arith.constant 0 : i32
    %c0_i32_1 = arith.constant 0 : i32
    return %c0_i32, %c0_i32_0 : i32, i32
  }
  func.func @transform_19(%arg0: i32, %arg1: i32) -> (i32, i32) {
    %c0_i32 = arith.constant 0 : i32
    %c0_i32_0 = arith.constant 0 : i32
    %c0_i32_1 = arith.constant 0 : i32
    return %c0_i32, %c0_i32_0 : i32, i32
  }
  func.func @transform_20(%arg0: i32, %arg1: i32) -> (i32, i32) {
    %c0_i32 = arith.constant 0 : i32
    %c0_i32_0 = arith.constant 0 : i32
    %c0_i32_1 = arith.constant 0 : i32
    return %c0_i32, %c0_i32_0 : i32, i32
  }
  func.func @transform_21(%arg0: i32, %arg1: i32) -> (i32, i32, i32, i32) {
    %c0_i32 = arith.constant 0 : i32
    %c0_i32_0 = arith.constant 0 : i32
    %c0_i32_1 = arith.constant 0 : i32
    return %arg0, %arg1, %c0_i32, %c0_i32_0 : i32, i32, i32, i32
  }
}

</mosaic_0001>

<bundles_post_ra>
// kernel: self_attention_layer_forward.1
= control target key start
LH: loop header
LB: loop body
LE: loop exit
PB: predicated region body
PF: predicated region fallthrough
CT: control target
= control target key end

     0   :  { %s3119_s25 = smov 0   ;;  %s3121_s26 = smov 0   ;;  %s3536_s0 = inlined_call_operand.vmem [shape: f32[2,4,15,32], index: 0, kind: input, shape index: {}]   ;;  %s3537_s1 = inlined_call_operand.vmem [shape: bf16[32,32], index: 1, kind: input, shape index: {}]   ;;  %s3538_s2 = inlined_call_operand.vmem [shape: bf16[32,64], index: 2, kind: input, shape index: {}]   ;;  %s3539_s3 = inlined_call_operand.vmem [shape: bf16[32,32], index: 3, kind: input, shape index: {}]   ;;  %s3540_s4 = inlined_call_operand.vmem [shape: f32[1,32], index: 4, kind: input, shape index: {}]   ;;  %s3541_s5 = inlined_call_operand.vmem [shape: f32[1,64], index: 5, kind: input, shape index: {}]   ;;  %s3542_s6 = inlined_call_operand.vmem [shape: f32[1,32], index: 6, kind: input, shape index: {}]   ;;  %s3543_s7 = inlined_call_operand.vmem [shape: bf16[32,32], index: 7, kind: input, shape index: {}]   ;;  %s3544_s8 = inlined_call_operand.vmem [shape: bf16[32,64], index: 8, kind: input, shape index: {}]   ;;  %s3545_s9 = inlined_call_operand.vmem [shape: bf16[32,32], index: 9, kind: input, shape index: {}]   ;;  %s3546_s10 = inlined_call_operand.vmem [shape: f32[1,32], index: 10, kind: input, shape index: {}]   ;;  %s3547_s11 = inlined_call_operand.vmem [shape: f32[1,64], index: 11, kind: input, shape index: {}]   ;;  %s3548_s12 = inlined_call_operand.vmem [shape: f32[1,32], index: 12, kind: input, shape index: {}]   ;;  %s3549_s13 = inlined_call_operand.vmem [shape: bf16[32,128], index: 13, kind: input, shape index: {}]   ;;  %s3550_s14 = inlined_call_operand.vmem [shape: f32[1,128], index: 14, kind: input, shape index: {}]   ;;  %s3551_s15 = inlined_call_operand.vmem [shape: bf16[128,32], index: 15, kind: input, shape index: {}]   ;;  %s3552_s16 = inlined_call_operand.vmem [shape: f32[1,32], index: 16, kind: input, shape index: {}]   ;;  %s3553_s17 = inlined_call_operand.vmem [shape: f32[1,32], index: 17, kind: input, shape index: {}]   ;;  %s3554_s18 = inlined_call_operand.vmem [shape: f32[1,32], index: 18, kind: input, shape index: {}]   ;;  %s3555_s19 = inlined_call_operand.vmem [shape: f32[1,32], index: 19, kind: input, shape index: {}]   ;;  %s3556_s20 = inlined_call_operand.vmem [shape: f32[1,32], index: 20, kind: input, shape index: {}]   ;;  %s3557_s21 = inlined_call_operand.vmem [shape: f32[2,4,15,32], index: 21, kind: output, shape index: {}]  }
   0x1   :  { %3574 = sst [smem:[#allocation6_spill]] %s3536_s0  ;;  %s3123_s27 = smov 0  }
   0x2   :  { %3575 = sst [smem:[#allocation7_spill]] %s3537_s1 }
   0x3   :  { %3576 = sst [smem:[#allocation8_spill]] %s3538_s2  ;;  %s3117_s2 = smov 0  }
   0x4   :  { %3577 = sst [smem:[#allocation9_spill]] %s3539_s3  ;;  %s3125_s3 = smov 0  }
   0x5   :  { %3578 = sst [smem:[#allocation10_spill]] %s3540_s4 }
   0x6   :  { %3579 = sst [smem:[#allocation11_spill]] %s3541_s5 }
   0x7 LB: > { %3580 = sst [smem:[#allocation3_spill]] %s2988_s27  ;;  %s40_s28 = sadd.s32 1, %s2984_s26  ;;  %s2992_s3 = sphi %s3125_s3, %s31_s3   ;;  %s2988_s27 = sphi %s3123_s27, %s3600_s27   ;;  %s2984_s26 = sphi %s3121_s26, %s3602_s26   ;;  %s2980_s25 = sphi %s3119_s25, %s3598_s25   ;;  %s2976_s2 = sphi %s3117_s2, %s3601_s2  }
   0x8   : > { %s43_s29 = sadd.s32 1, %s2988_s27  ;;  %p41_p0 = scmp.ge.s32.totalorder %s40_s28, 4 }
   0x9   : > { %p2508_p1 = scmp.ge.s32.totalorder %s2992_s3, 1  ;;  %p607_p2 = scmp.lt.s32.totalorder %s2992_s3, 9 }
   0xa   : > { %s3604_s28 = smov (%p41_p0, %s40_s28), 0  ;;  %s3606_s29 = smov (!%p41_p0, %s43_s29), %s2988_s27 }
   0xb   : > { %3581 = sst [smem:[#allocation4_spill]] %s3604_s28  ;;  %p608_p3 = pnand %p2508_p1, %p607_p2 }
   0xc   : > { %p45_p4 = scmp.ge.s32.totalorder %s3606_s29, 2  ;;  %s3583_s30 = sld [smem:[#allocation7_spill]] (!%p608_p3)  ;;  %v2994_v1 = vmov (!%p608_p3), 0.0   ;;  %vm2995_vm0 = vmmov (!%p608_p3), 0   ;;  %vm1370_vm1 = vcmask (!%p608_p3), 260096   ;;  %vm720_vm2 = vcmask (!%p608_p3), 261120  }
   0xd   : > { %611 = sbr.rel (%p608_p3) target bundleno = 4017 (0xfb1), region = 104  ;;  %2636 = vmatprep.subr.bf16.mxu0 (!%p608_p3), %v2994_v1  ;;  %2658 = vmatprep.subr.bf16.mxu1 (!%p608_p3), %v2994_v1  ;;  %p675_p5 = scmp.lt.s32.totalorder (!%p608_p3), %s2980_s25, 1  ;;  %vm843_vm3 = vcmask (!%p608_p3), 64512   ;;  %vm890_vm4 = vcmask (!%p608_p3), 92160   ;;  %vm910_vm5 = vcmask (!%p608_p3), 1045504   ;;  %vm906_vm6 = vcmask (!%p608_p3), 97280  }
   0xe   : > { %s3608_s29 = smov (%p45_p4, %s3606_s29), 0  ;;  %2640 = vmatprep.mubr.msk.bf16.mxu0 (!%p608_p3), %vm2995_vm0, %v2994_v1  ;;  %p677_p6 = scmp.lt.s32.totalorder (!%p608_p3), %s2976_s2, 3  ;;  %2660 = vmatprep.mubr.msk.bf16.mxu1 (!%p608_p3), %vm2995_vm0, %v2994_v1  ;;  %vm1298_vm7 = vcmask (!%p608_p3), 130048   ;;  %vm1300_vm8 = vcmask (!%p608_p3), 195584   ;;  %vm1372_vm9 = vcmask (!%p608_p3), 256000   ;;  %vm1559_vm10 = vcmask (!%p608_p3), 121856  }
   0xf   : > { %3582 = sst [smem:[#allocation5_spill]] %s3608_s29  ;;  %s3584_s22 = sld [smem:[#allocation8_spill]] (!%p608_p3)  ;;  %vm1563_vm11 = vcmask (!%p608_p3), 117760   ;;  %vm1590_vm12 = vcmask (!%p608_p3), 1046528   ;;  %vm1591_vm13 = vcmask (!%p608_p3), 1047552   ;;  %vm2118_vm14 = vcmask (!%p608_p3), 261123  }
  0x10   : > { %s3585_s28 = sld [smem:[#allocation6_spill]] (!%p608_p3)  ;;  %s3586_s29 = sld [smem:[#allocation10_spill]] (!%p608_p3)  ;;  %vm2108_vm15 = vcmask (!%p608_p3), 1042432  }
  0x11   : > { %s3572_s4 = smov (!%p608_p3), 112   ;;  %s2997_s5 = smov (!%p608_p3), 120  }
  0x12   : > { %v2876_v0 = vld [vmem:[%s3583_s30] sm:$0xff] (!%p608_p3)   ;;  %v2877_v2 = vld [vmem:[%s3583_s30 + $0x8] sm:$0xff] (!%p608_p3)   ;;  %s3567_s30 = smov (!%p608_p3), 16  }
  0x13   : > { %2637 = vmatpush3.bf16.msra.mxu0 (!%p608_p3), %v2876_v0 }
  0x14   : > { %2638 = vmatprep.subr.bf16.mxu0 %v2994_v1  ;;  %s3610_s25 = smov (!%p675_p5, %s2980_s25), 1  ;;  %s3612_s2 = smov (!%p677_p6, %s2976_s2), 3 }
  0x15   : > { %s2510_s23 = sshll.u32 %s3610_s25, 3  ;;  %s2509_s1 = sshll.u32 %s3612_s2, 1  ;;  %v2878_v3 = vld [vmem:[%s3584_s22] sm:$0xff]   ;;  %v2879_v8 = vld [vmem:[%s3584_s22 + $0x8] sm:$0xff]  }
  0x16   : > { %s3161_s24 = sadd.s32 %s2510_s23, %s2509_s1  ;;  %v2515_v18 = vld [vmem:[%s3586_s29] ss:$0 sm:$0xff]  ;;  %s3587_s1 = sld [smem:[#allocation11_spill]] }
  0x17   : > { %2639 = vmatpush3.bf16.msra.mxu0 %v2877_v2  ;;  %s2511_s0 = sshll.u32 %s3161_s24, 3  ;;  %s3570_s2 = smov 104  }
  0x18   : > { %2644 = vmatprep.subr.bf16.mxu0 %v2994_v1  ;;  %s683_s27 = scalar_lea.vmem %s3585_s28, %s2511_s0  ;;  %s3569_s25 = smov 96  }
  0x19   : > { %v3172_v4 = vld [vmem:[%s683_s27] sm:$0xff]  ;;  %v3174_v5 = vld [vmem:[%s683_s27 + $0x8] sm:$0x7f]  ;;  %s3565_s27 = smov 80   ;;  %s3564_s28 = smov 72  }
  0x1a   : > { %v696_v6 = vpack.c.bf16 %v3172_v4, %v3172_v4  ;;  %v764_v7 = vpack.c.bf16 %v3174_v5, %v3172_v4  ;;  %1371 = vst.msk [vmem:[#allocation2 + $0x8] sm:$0x7f] %vm1370_vm1, %v3174_v5  ;;  %s3563_s29 = smov 88   ;;  %s3566_s23 = smov 24  }
  0x1b   : > { %1369 = vst.msk [vmem:[#allocation2] sm:$0xff] %vm720_vm2, %v3172_v4 }
  0x1c   : > { %2641 = vmatmul.mubr.msk.bf16.vlgmr.msra.gmra.mrb[0].mxu0 %vm720_vm2, %v696_v6  ;;  %v777_v9 = vshrl.u32 %v764_v7, 16  ;;  %v780_v10 = vshll.u32 %v764_v7, 16  ;;  %v2519_v19 = vld [vmem:[%s3587_s1] ss:$0 sm:$0xff]  ;;  %s3588_s1 = sld [smem:[#allocation9_spill]] }
  0x1d   : > { %2645 = vmatpush3.bf16.msra.mxu0 %v2878_v3  ;;  %2648 = vmatprep.mubr.msk.bf16.mxu0 %vm2995_vm0, %v2994_v1 }
  0x1e   : > { %2646 = vmatprep.subr.bf16.mxu0 %v2994_v1  ;;  %v779_v11 = vrot.slane %v777_v9, 1  ;;  %v782_v12 = vrot.slane %v780_v10, 2 }
  0x20   : > { %v3191_v13 = vor.u32 %v782_v12, %v779_v11 }
  0x21   : > { %2647 = vmatpush3.bf16.msra.mxu0 %v2879_v8 }
  0x22   : > { %2652 = vmatprep.subr.bf16.mxu0 %v2994_v1 }
  0x24   : > { %2649 = vmatmul.mubr.msk.bf16.vlgmr.msra.gmra.mrb[4].mxu0 %vm720_vm2, %v3191_v13 }
  0x25   : > { %2654 = vmatprep.mubr.msk.bf16.mxu0 %vm2995_vm0, %v2994_v1 }
  0xef   : > { %v758_v14 = vpop.f32.mrb[0].mxu0 }
  0xf0   : > { %v2642_v15 = vpop.f32.mrb[1].mxu0  ;;  %v759_v21 = vadd.f32 %v2515_v18, %v758_v14 }
  0xf1   : > { %v761_v16 = vpop.f32.mrb[2].mxu0 }
  0xf2   : > { %v2643_v17 = vpop.f32.mrb[3].mxu0  ;;  %v840_v27 = vmul.f32 0.35355338, %v759_v21 }
  0xf4   : > { %v841_v30 = vpack.c.bf16 %v840_v27, %v840_v27 }
  0xf7   : > { %v833_v20 = vpop.f32.mrb[4].mxu0 }
  0xf8   : > { %v2650_v22 = vpop.f32.mrb[5].mxu0  ;;  %v834_v24 = vadd.f32 %v2519_v19, %v833_v20 }
  0xf9   : > { %v836_v23 = vpop.f32.mrb[6].mxu0 }
  0xfa   : > { %v837_v25 = vadd.f32 %v2519_v19, %v836_v23  ;;  %v2651_v26 = vpop.f32.mrb[7].mxu0 }
  0xfc   : > { %v3204_v28 = vpack.c.bf16 %v837_v25, %v834_v24 }
  0xfe   : > { %1067 = vrot.lane.b32.xlu1 %v3204_v28, %s3572_s4  ;;  %957 = vrot.lane.b32.xlu0 %v3204_v28, %s2997_s5  ;;  %v848_v29 = vsel %vm843_vm3, %v3204_v28, 0 }
  0xff   : > { %2653 = vmatpush3.bf16.xpose.msra.mxu0 %v848_v29 }
 0x100   : > { %2664 = vmatprep.subr.bf16.mxu0 %v2994_v1 }
 0x102   : > { %1065 = vrot.lane.b32.xlu1 %v841_v30, %s3572_s4  ;;  %955 = vrot.lane.b32.xlu0 %v841_v30, %s2997_s5  ;;  %s3593_s4 = smov 72  }
 0x106   : > { %1175 = vrot.lane.b32.xlu1 %v841_v30, %s3570_s2  ;;  %1177 = vrot.lane.b32.xlu0 %v3204_v28, %s3570_s2  ;;  %s3594_s2 = smov 88  }
 0x107   : > { %2655 = vmatmul.mubr.msk.bf16.vlgmr.msra.gmra.mrb[8].mxu0 %vm843_vm3, %v841_v30 }
 0x108   : > { %2666 = vmatprep.mubr.msk.bf16.mxu0 %vm2995_vm0, %v2994_v1 }
 0x170   : > { %v958_v31 = vpop.permute.xlu0 %957  ;;  %v1068_v33 = vpop.permute.xlu1 %1067 }
 0x171   : > { %v963_v32 = vsel %vm843_vm3, %v958_v31, 0  ;;  %v1073_v35 = vsel %vm843_vm3, %v1068_v33, 0 }
 0x172   : > { %2665 = vmatpush3.bf16.xpose.msra.mxu0 %v963_v32 }
 0x173   : > { %2676 = vmatprep.subr.bf16.mxu0 %v2994_v1 }
 0x174   : > { %v956_v34 = vpop.permute.xlu0 %955  ;;  %v1066_v37 = vpop.permute.xlu1 %1065 }
 0x178   : > { %v1178_v36 = vpop.permute.xlu0 %1177  ;;  %v1176_v39 = vpop.permute.xlu1 %1175 }
 0x179   : > { %2667 = vmatmul.mubr.msk.bf16.vlgmr.msra.gmra.mrb[12].mxu0 %vm843_vm3, %v956_v34  ;;  %v1183_v38 = vsel %vm843_vm3, %v1178_v36, 0 }
 0x17a   : > { %2677 = vmatpush3.bf16.xpose.msra.mxu0 %v1073_v35  ;;  %2678 = vmatprep.mubr.msk.bf16.mxu0 %vm2995_vm0, %v2994_v1 }
 0x17b   : > { %2688 = vmatprep.subr.bf16.mxu0 %v2994_v1 }
 0x181   : > { %2679 = vmatmul.mubr.msk.bf16.vlgmr.msra.gmra.mrb[16].mxu0 %vm843_vm3, %v1066_v37 }
 0x182   : > { %2689 = vmatpush3.bf16.xpose.msra.mxu0 %v1183_v38  ;;  %2690 = vmatprep.mubr.msk.bf16.mxu0 %vm2995_vm0, %v2994_v1 }
 0x183   : > { %2700 = vmatprep.subr.bf16.mxu0 %v2994_v1 }
 0x189   : > { %2691 = vmatmul.mubr.msk.bf16.vlgmr.msra.gmra.mrb[20].mxu0 %vm843_vm3, %v1176_v39 }
 0x18a   : > { %2704 = vmatprep.mubr.msk.bf16.mxu0 %vm2995_vm0, %v2994_v1 }
 0x1da   : > { %v884_v40 = vpop.f32.mrb[8].mxu0 }
 0x1db   : > { %v2656_v41 = vpop.f32.mrb[9].mxu0  ;;  %v891_v42 = vsel %vm890_vm4, %v884_v40, -inf }
 0x1dc   : > { %892 = vmax.xlane.f32.xlu0 %v891_v42  ;;  %v887_v43 = vpop.f32.mrb[10].mxu0 }
 0x1dd   : > { %v2657_v44 = vpop.f32.mrb[11].mxu0 }
 0x24c   : > { %v999_v45 = vpop.f32.mrb[12].mxu0 }
 0x24d   : > { %v2668_v46 = vpop.f32.mrb[13].mxu0  ;;  %v1005_v47 = vsel %vm890_vm4, %v999_v45, -inf }
 0x24e   : > { %1006 = vmax.xlane.f32.xlu1 %v1005_v47  ;;  %v1002_v48 = vpop.f32.mrb[14].mxu0 }
 0x24f   : > { %v2669_v49 = vpop.f32.mrb[15].mxu0  ;;  %v2880_v48 = vld [vmem:[%s3588_s1] sm:$0xff]  }
 0x250   : > { %2701 = vmatpush3.bf16.msra.mxu0 %v2880_v48 }
 0x251   : > { %2702 = vmatprep.subr.bf16.mxu0 %v2994_v1 }
 0x254   : > { %v1109_v50 = vpop.f32.mrb[16].mxu0 }
 0x255   : > { %v2680_v51 = vpop.f32.mrb[17].mxu0  ;;  %v1115_v52 = vsel %vm890_vm4, %v1109_v50, -inf }
 0x256   : > { %1116 = vmax.xlane.f32.xlu0 %v1115_v52  ;;  %v1112_v53 = vpop.f32.mrb[18].mxu0 }
 0x257   : > { %v2681_v54 = vpop.f32.mrb[19].mxu0  ;;  %v2881_v53 = vld [vmem:[%s3588_s1 + $0x8] sm:$0xff]  }
 0x258   : > { %2703 = vmatpush3.bf16.msra.mxu0 %v2881_v53 }
 0x259   : > { %2716 = vmatprep.subr.bf16.mxu0 %v2994_v1 }
 0x25c   : > { %v1219_v55 = vpop.f32.mrb[20].mxu0 }
 0x25d   : > { %v2692_v56 = vpop.f32.mrb[21].mxu0  ;;  %v1225_v57 = vsel %vm890_vm4, %v1219_v55, -inf }
 0x25e   : > { %1226 = vmax.xlane.f32.xlu0 %v1225_v57  ;;  %v1222_v58 = vpop.f32.mrb[22].mxu0 }
 0x25f   : > { %v2693_v59 = vpop.f32.mrb[23].mxu0 }
 0x269   : > { %v893_v60 = vpop.xlane.xlu0 %892 }
 0x26a   : > { %v894_v61 = vsub.f32 %v884_v40, %v893_v60 }
 0x26c   : > { %v895_v62 = vmul.f32 1.442695, %v894_v61 }
 0x26e   : > { %2898 = vpow2.f32 %v895_v62 }
 0x278   : > { %v2899_v63 = vpop.eup %2898 }
 0x279   : > { %v897_v0 = vsel %vm890_vm4, %v2899_v63, 0.0 }
 0x27a   : > { %898 = vadd.xlane.f32.xlu1 %v897_v0 }
 0x28b   : > { %904 = vrot.lane.b32.xlu1 %v3204_v28, %s3569_s25  ;;  %s3596_s25 = smov 16  }
 0x2db   : > { %v1007_v2 = vpop.xlane.xlu1 %1006 }
 0x2dc   : > { %v1008_v3 = vsub.f32 %v999_v45, %v1007_v2 }
 0x2de   : > { %v1009_v6 = vmul.f32 1.442695, %v1008_v3 }
 0x2e0   : > { %2900 = vpow2.f32 %v1009_v6 }
 0x2e3   : > { %v1117_v7 = vpop.xlane.xlu0 %1116 }
 0x2e4   : > { %v1118_v8 = vsub.f32 %v1109_v50, %v1117_v7 }
 0x2e6   : > { %v1119_v9 = vmul.f32 1.442695, %v1118_v8  ;;  %v2882_v8 = vld [vmem:[%s3543_s7] sm:$0xff]  }
 0x2e8   : > { %2902 = vpow2.f32 %v1119_v9  ;;  %v2883_v9 = vld [vmem:[%s3543_s7 + $0x8] sm:$0xff]  }
 0x2ea   : > { %v2901_v10 = vpop.eup %2900 }
 0x2eb   : > { %v1227_v11 = vpop.xlane.xlu0 %1226  ;;  %v1011_v12 = vsel %vm890_vm4, %v2901_v10, 0.0 }
 0x2ec   : > { %v1228_v14 = vsub.f32 %v1219_v55, %v1227_v11  ;;  %1012 = vadd.xlane.f32.xlu0 %v1011_v12  ;;  %v2885_v11 = vld [vmem:[%s3544_s8 + $0x8] sm:$0xff]   ;;  %v2531_v12 = vld [vmem:[%s3542_s6] ss:$0 sm:$0xff] }
 0x2ee   : > { %v1229_v15 = vmul.f32 1.442695, %v1228_v14 }
 0x2f0   : > { %2904 = vpow2.f32 %v1229_v15 }
 0x2f2   : > { %v2903_v16 = vpop.eup %2902 }
 0x2f3   : > { %v1121_v17 = vsel %vm890_vm4, %v2903_v16, 0.0 }
 0x2f4   : > { %1122 = vadd.xlane.f32.xlu1 %v1121_v17 }
 0x2fa   : > { %v2905_v18 = vpop.eup %2904 }
 0x2fb   : > { %v1231_v19 = vsel %vm890_vm4, %v2905_v18, 0.0 }
 0x2fc   : > { %1232 = vadd.xlane.f32.xlu0 %v1231_v19 }
 0x305   : > { %1127 = vrot.lane.b32.xlu1 %v3204_v28, %s3565_s27  ;;  %s3590_s27 = smov 104  }
 0x307   : > { %v899_v20 = vpop.xlane.xlu1 %898 }
 0x308   : > { %2906 = vrcp.f32 %v899_v20 }
 0x309   : > { %1237 = vrot.lane.b32.xlu1 %v3204_v28, %s3564_s28 }
 0x30b   : > { %v905_v21 = vpop.permute.xlu1 %904 }
 0x30c   : > { %v912_v22 = vsel %vm910_vm5, %v905_v21, 0  ;;  %v2535_v21 = vld [vmem:[%s3546_s10] ss:$0 sm:$0xff] }
 0x30d   : > { %2659 = vmatpush3.bf16.msra.mxu1 %v912_v22 }
 0x30e   : > { %2670 = vmatprep.subr.bf16.mxu1 %v2994_v1 }
 0x312   : > { %v2907_v23 = vpop.eup %2906  ;;  %1017 = vrot.lane.b32.xlu0 %v3204_v28, %s3563_s29  ;;  %s3568_s29 = smov 8  }
 0x313   : > { %v901_v24 = vmul.f32 %v2907_v23, %v2899_v63 }
 0x315   : > { %v902_v25 = vpack.c.bf16 %v901_v24, %v901_v24 }
 0x317   : > { %2661 = vmatmul.mubr.msk.bf16.vlgmr.msra.gmra.mrb[0].mxu1 %vm906_vm6, %v902_v25 }
 0x318   : > { %2672 = vmatprep.mubr.msk.bf16.mxu1 %vm2995_vm0, %v2994_v1 }
 0x379   : > { %v1013_v26 = vpop.xlane.xlu0 %1012 }
 0x37a   : > { %2908 = vrcp.f32 %v1013_v26 }
 0x381   : > { %v1123_v27 = vpop.xlane.xlu1 %1122 }
 0x382   : > { %2910 = vrcp.f32 %v1123_v27 }
 0x384   : > { %v2909_v29 = vpop.eup %2908 }
 0x385   : > { %v1015_v31 = vmul.f32 %v2909_v29, %v2901_v10  ;;  %v1128_v34 = vpop.permute.xlu1 %1127  ;;  %v2884_v10 = vld [vmem:[%s3544_s8] sm:$0xff]  }
 0x386   : > { %v1133_v36 = vsel %vm910_vm5, %v1128_v34, 0 }
 0x387   : > { %v1016_v28 = vpack.c.bf16 %v1015_v31, %v1015_v31 }
 0x389   : > { %v1233_v30 = vpop.xlane.xlu0 %1232  ;;  %v1238_v38 = vpop.permute.xlu1 %1237 }
 0x38a   : > { %2912 = vrcp.f32 %v1233_v30  ;;  %v1243_v41 = vsel %vm910_vm5, %v1238_v38, 0 }
 0x38c   : > { %v2911_v35 = vpop.eup %2910 }
 0x38d   : > { %v1018_v32 = vpop.permute.xlu0 %1017  ;;  %v1125_v37 = vmul.f32 %v2911_v35, %v2903_v16 }
 0x38e   : > { %v1023_v33 = vsel %vm910_vm5, %v1018_v32, 0  ;;  %v2539_v32 = vld [vmem:[%s3547_s11] ss:$0 sm:$0xff] }
 0x38f   : > { %2671 = vmatpush3.bf16.msra.mxu1 %v1023_v33  ;;  %v1126_v39 = vpack.c.bf16 %v1125_v37, %v1125_v37 }
 0x390   : > { %2682 = vmatprep.subr.bf16.mxu1 %v2994_v1 }
 0x392   : > { %2673 = vmatmul.mubr.msk.bf16.vlgmr.msra.gmra.mrb[4].mxu1 %vm906_vm6, %v1016_v28 }
 0x393   : > { %2683 = vmatpush3.bf16.msra.mxu1 %v1133_v36  ;;  %2684 = vmatprep.mubr.msk.bf16.mxu1 %vm2995_vm0, %v2994_v1 }
 0x394   : > { %2694 = vmatprep.subr.bf16.mxu1 %v2994_v1  ;;  %v2913_v40 = vpop.eup %2912 }
 0x395   : > { %v1235_v42 = vmul.f32 %v2913_v40, %v2905_v18  ;;  %v1375_v18 = vld [vmem:[#allocation2 + $0x8] sm:$0x7f] }
 0x397   : > { %v1236_v43 = vpack.c.bf16 %v1235_v42, %v1235_v42 }
 0x39a   : > { %2685 = vmatmul.mubr.msk.bf16.vlgmr.msra.gmra.mrb[8].mxu1 %vm906_vm6, %v1126_v39 }
 0x39b   : > { %2695 = vmatpush3.bf16.msra.mxu1 %v1243_v41  ;;  %2696 = vmatprep.mubr.msk.bf16.mxu1 %vm2995_vm0, %v2994_v1 }
 0x39c   : > { %2708 = vmatprep.subr.bf16.mxu1 %v2994_v1 }
 0x3a2   : > { %2697 = vmatmul.mubr.msk.bf16.vlgmr.msra.gmra.mrb[12].mxu1 %vm906_vm6, %v1236_v43 }
 0x3a3   : > { %2712 = vmatprep.mubr.msk.bf16.mxu1 %vm2995_vm0, %v2994_v1  ;;  %2709 = vmatpush3.bf16.msra.mxu1 %v2882_v8 }
 0x3a4   : > { %2710 = vmatprep.subr.bf16.mxu1 %v2994_v1 }
 0x3a7   : > { %2711 = vmatpush3.bf16.msra.mxu1 %v2883_v9 }
 0x3a8   : > { %2724 = vmatprep.subr.bf16.mxu1 %v2994_v1 }
 0x3aa   : > { %2713 = vmatmul.mubr.msk.bf16.vlgmr.msra.gmra.mrb[16].mxu1 %vm720_vm2, %v3191_v13 }
 0x3ab   : > { %2726 = vmatprep.mubr.msk.bf16.mxu1 %vm2995_vm0, %v2994_v1 }
 0x3ea   : > { %v948_v44 = vpop.f32.mrb[0].mxu1 }
 0x3eb   : > { %v2662_v45 = vpop.f32.mrb[1].mxu1 }
 0x3ec   : > { %v951_v46 = vpop.f32.mrb[2].mxu1 }
 0x3ed   : > { %v2663_v47 = vpop.f32.mrb[3].mxu1 }
 0x465   : > { %v1059_v49 = vpop.f32.mrb[4].mxu1 }
 0x466   : > { %1286 = vrot.lane.b32.xlu0 %v1059_v49, %s3568_s29  ;;  %v2674_v50 = vpop.f32.mrb[5].mxu1  ;;  %s3592_s29 = smov 80  }
 0x467   : > { %v1062_v51 = vpop.f32.mrb[6].mxu1 }
 0x468   : > { %v2675_v52 = vpop.f32.mrb[7].mxu1 }
 0x46d   : > { %v1169_v54 = vpop.f32.mrb[8].mxu1 }
 0x46e   : > { %1290 = vrot.lane.b32.xlu1 %v1169_v54, %s3567_s30  ;;  %v2686_v55 = vpop.f32.mrb[9].mxu1  ;;  %s3317_s30 = scalar_lea.vmem %s3557_s21, %s2511_s0 }
 0x46f   : > { %v1172_v56 = vpop.f32.mrb[10].mxu1 }
 0x470   : > { %v2687_v57 = vpop.f32.mrb[11].mxu1 }
 0x475   : > { %v1279_v58 = vpop.f32.mrb[12].mxu1 }
 0x476   : > { %1294 = vrot.lane.b32.xlu0 %v1279_v58, %s3566_s23  ;;  %v2698_v59 = vpop.f32.mrb[13].mxu1  ;;  %s3589_s23 = smov 112  }
 0x477   : > { %v1282_v60 = vpop.f32.mrb[14].mxu1 }
 0x478   : > { %v2699_v61 = vpop.f32.mrb[15].mxu1 }
 0x47d   : > { %v1433_v22 = vpop.f32.mrb[16].mxu1 }
 0x47e   : > { %v1434_v23 = vadd.f32 %v2535_v21, %v1433_v22  ;;  %v2714_v24 = vpop.f32.mrb[17].mxu1 }
 0x47f   : > { %v1436_v25 = vpop.f32.mrb[18].mxu1 }
 0x480   : > { %v1508_v26 = vmul.f32 0.35355338, %v1434_v23  ;;  %v1437_v27 = vadd.f32 %v2535_v21, %v1436_v25  ;;  %v2715_v29 = vpop.f32.mrb[19].mxu1 }
 0x482   : > { %v1509_v30 = vmul.f32 0.35355338, %v1437_v27 }
 0x484   : > { %v1510_v31 = vpack.c.bf16 %v1509_v30, %v1508_v26 }
 0x486   : > { %1639 = vrot.lane.b32.xlu0 %v1510_v31, %s2997_s5 }
 0x48a   : > { %1762 = vrot.lane.b32.xlu0 %v1510_v31, %s3589_s23 }
 0x48e   : > { %1885 = vrot.lane.b32.xlu0 %v1510_v31, %s3590_s27 }
 0x4d8   : > { %v1287_v62 = vpop.permute.xlu0 %1286 }
 0x4d9   : > { %v1297_v0 = vsel %vm843_vm3, %v948_v44, %v1287_v62 }
 0x4e0   : > { %v1291_v63 = vpop.permute.xlu1 %1290 }
 0x4e1   : > { %v1299_v2 = vsel %vm1298_vm7, %v1297_v0, %v1291_v63 }
 0x4e8   : > { %v1295_v3 = vpop.permute.xlu0 %1294 }
 0x4e9   : > { %v1301_v6 = vsel %vm1300_vm8, %v1299_v2, %v1295_v3 }
 0x4ea   : > { %v1302_v7 = vpack.c.bf16 %v1301_v6, %v1301_v6 }
 0x4ec   : > { %2705 = vmatmul.mubr.msk.bf16.vlgmr.msra.gmra.mrb[24].mxu0 %vm720_vm2, %v1302_v7 }
 0x4ed   : > { %2720 = vmatprep.mubr.msk.bf16.mxu0 %vm2995_vm0, %v2994_v1  ;;  %2717 = vmatpush3.bf16.msra.mxu0 %v2884_v10 }
 0x4ee   : > { %2718 = vmatprep.subr.bf16.mxu0 %v2994_v1 }
 0x4f1   : > { %2719 = vmatpush3.bf16.msra.mxu0 %v2885_v11 }
 0x4f2   : > { %2730 = vmatprep.subr.bf16.mxu0 %v2994_v1 }
 0x4f8   : > { %v1640_v43 = vpop.permute.xlu0 %1639 }
 0x4fc   : > { %v1763_v46 = vpop.permute.xlu0 %1762 }
 0x500   : > { %v1886_v48 = vpop.permute.xlu0 %1885 }
 0x5bf   : > { %v1363_v14 = vpop.f32.mrb[24].mxu0 }
 0x5c0   : > { %v1364_v15 = vadd.f32 %v2531_v12, %v1363_v14  ;;  %v2706_v13 = vpop.f32.mrb[25].mxu0 }
 0x5c1   : > { %v1366_v16 = vpop.f32.mrb[26].mxu0 }
 0x5c2   : > { %1373 = vst.msk [vmem:[#allocation2] sm:$0x7] %vm1372_vm9, %v1364_v15  ;;  %2406 = vst.msk [vmem:[%s3317_s30] sm:$0x7] %vm1372_vm9, %v1364_v15  ;;  %v2707_v17 = vpop.f32.mrb[27].mxu0 }
 0x5c9   : > { %v1374_v19 = vld [vmem:[#allocation2] sm:$0xff] }
 0x5ca   : > { %v1440_v20 = vpack.c.bf16 %v1375_v18, %v1374_v19 }
 0x5cc   : > { %2721 = vmatmul.mubr.msk.bf16.vlgmr.msra.gmra.mrb[28].mxu0 %vm720_vm2, %v1440_v20 }
 0x5cd   : > { %2732 = vmatprep.mubr.msk.bf16.mxu0 %vm2995_vm0, %v2994_v1 }
 0x69f   : > { %v1501_v33 = vpop.f32.mrb[28].mxu0 }
 0x6a0   : > { %v2722_v34 = vpop.f32.mrb[29].mxu0  ;;  %v1502_v35 = vadd.f32 %v2539_v32, %v1501_v33 }
 0x6a1   : > { %v1504_v28 = vpop.f32.mrb[30].mxu0 }
 0x6a2   : > { %v1505_v36 = vadd.f32 %v2539_v32, %v1504_v28  ;;  %v2723_v37 = vpop.f32.mrb[31].mxu0 }
 0x6a4   : > { %v3332_v38 = vpack.c.bf16 %v1505_v36, %v1502_v35 }
 0x6a6   : > { %1641 = vrot.lane.b32.xlu1 %v3332_v38, %s2997_s5  ;;  %v1516_v39 = vsel %vm843_vm3, %v3332_v38, 0  ;;  %s3591_s5 = smov 96  }
 0x6a7   : > { %2725 = vmatpush3.bf16.xpose.msra.mxu1 %v1516_v39 }
 0x6a8   : > { %2736 = vmatprep.subr.bf16.mxu1 %v2994_v1 }
 0x6aa   : > { %1764 = vrot.lane.b32.xlu1 %v3332_v38, %s3589_s23  ;;  %s3595_s23 = smov 8  }
 0x6ae   : > { %1887 = vrot.lane.b32.xlu1 %v3332_v38, %s3590_s27  ;;  %2727 = vmatmul.mubr.msk.bf16.vlgmr.msra.gmra.mrb[20].mxu1 %vm843_vm3, %v1510_v31 }
 0x6af   : > { %2738 = vmatprep.mubr.msk.bf16.mxu1 %vm2995_vm0, %v2994_v1 }
 0x718   : > { %v1642_v40 = vpop.permute.xlu1 %1641 }
 0x719   : > { %v1647_v41 = vsel %vm843_vm3, %v1642_v40, 0 }
 0x71a   : > { %2737 = vmatpush3.bf16.xpose.msra.mxu1 %v1647_v41 }
 0x71b   : > { %2748 = vmatprep.subr.bf16.mxu1 %v2994_v1 }
 0x71c   : > { %v1765_v42 = vpop.permute.xlu1 %1764 }
 0x71d   : > { %v1770_v44 = vsel %vm843_vm3, %v1765_v42, 0 }
 0x720   : > { %v1888_v45 = vpop.permute.xlu1 %1887 }
 0x721   : > { %2739 = vmatmul.mubr.msk.bf16.vlgmr.msra.gmra.mrb[24].mxu1 %vm843_vm3, %v1640_v43  ;;  %v1893_v47 = vsel %vm843_vm3, %v1888_v45, 0 }
 0x722   : > { %2749 = vmatpush3.bf16.xpose.msra.mxu1 %v1770_v44  ;;  %2750 = vmatprep.mubr.msk.bf16.mxu1 %vm2995_vm0, %v2994_v1 }
 0x723   : > { %2760 = vmatprep.subr.bf16.mxu1 %v2994_v1 }
 0x729   : > { %2751 = vmatmul.mubr.msk.bf16.vlgmr.msra.gmra.mrb[28].mxu1 %vm843_vm3, %v1763_v46 }
 0x72a   : > { %2761 = vmatpush3.bf16.xpose.msra.mxu1 %v1893_v47  ;;  %2762 = vmatprep.mubr.msk.bf16.mxu1 %vm2995_vm0, %v2994_v1 }
 0x72b   : > { %2772 = vmatprep.subr.bf16.mxu1 %v2994_v1 }
 0x731   : > { %2763 = vmatmul.mubr.msk.bf16.vlgmr.msra.gmra.mrb[32].mxu1 %vm843_vm3, %v1886_v48 }
 0x732   : > { %2776 = vmatprep.mubr.msk.bf16.mxu1 %vm2995_vm0, %v2994_v1 }
 0x781   : > { %v1552_v49 = vpop.f32.mrb[20].mxu1 }
 0x782   : > { %v2728_v50 = vpop.f32.mrb[21].mxu1  ;;  %v1560_v51 = vsel %vm1559_vm10, %v1552_v49, -inf }
 0x783   : > { %1561 = vmax.xlane.f32.xlu1 %v1560_v51  ;;  %v1555_v52 = vpop.f32.mrb[22].mxu1 }
 0x784   : > { %v2729_v53 = vpop.f32.mrb[23].mxu1  ;;  %v1564_v54 = vsel %vm1563_vm11, %v1555_v52, -inf }
 0x785   : > { %1565 = vmax.xlane.f32.xlu0 %v1564_v54  ;;  %v3006_v53 = vmov 65535  }
 0x786   : > { %v1592_v54 = vsel %vm1590_vm12, 4294967295, %v3006_v53 }
 0x7f4   : > { %v1683_v55 = vpop.f32.mrb[24].mxu1 }
 0x7f5   : > { %v2740_v56 = vpop.f32.mrb[25].mxu1  ;;  %v1690_v57 = vsel %vm1559_vm10, %v1683_v55, -inf }
 0x7f6   : > { %1691 = vmax.xlane.f32.xlu0 %v1690_v57  ;;  %v1686_v58 = vpop.f32.mrb[26].mxu1  ;;  %v1593_v57 = vsel %vm1591_vm13, %v1592_v54, 0 }
 0x7f7   : > { %v2741_v59 = vpop.f32.mrb[27].mxu1  ;;  %v1693_v60 = vsel %vm1563_vm11, %v1686_v58, -inf }
 0x7f8   : > { %1694 = vmax.xlane.f32.xlu1 %v1693_v60 }
 0x7fc   : > { %v1806_v61 = vpop.f32.mrb[28].mxu1 }
 0x7fd   : > { %v2752_v62 = vpop.f32.mrb[29].mxu1  ;;  %v1813_v63 = vsel %vm1559_vm10, %v1806_v61, -inf }
 0x7fe   : > { %1814 = vmax.xlane.f32.xlu0 %v1813_v63  ;;  %v1809_v0 = vpop.f32.mrb[30].mxu1 }
 0x7ff   : > { %v2753_v2 = vpop.f32.mrb[31].mxu1  ;;  %v1816_v3 = vsel %vm1563_vm11, %v1809_v0, -inf }
 0x800   : > { %1817 = vmax.xlane.f32.xlu1 %v1816_v3 }
 0x804   : > { %v1929_v6 = vpop.f32.mrb[32].mxu1 }
 0x805   : > { %v2764_v7 = vpop.f32.mrb[33].mxu1  ;;  %v1936_v8 = vsel %vm1559_vm10, %v1929_v6, -inf }
 0x806   : > { %1937 = vmax.xlane.f32.xlu0 %v1936_v8  ;;  %v1932_v9 = vpop.f32.mrb[34].mxu1 }
 0x807   : > { %v2765_v10 = vpop.f32.mrb[35].mxu1  ;;  %v1939_v11 = vsel %vm1563_vm11, %v1932_v9, -inf }
 0x808   : > { %1940 = vmax.xlane.f32.xlu1 %v1939_v11 }
 0x810   : > { %v1562_v12 = vpop.xlane.xlu1 %1561 }
 0x811   : > { %v1567_v14 = vsub.f32 %v1552_v49, %v1562_v12 }
 0x812   : > { %v1566_v15 = vpop.xlane.xlu0 %1565 }
 0x813   : > { %v1569_v13 = vmul.f32 1.442695, %v1567_v14  ;;  %v1568_v16 = vsub.f32 %v1555_v52, %v1566_v15 }
 0x815   : > { %2914 = vpow2.f32 %v1569_v13  ;;  %v1571_v17 = vmul.f32 1.442695, %v1568_v16 }
 0x817   : > { %2916 = vpow2.f32 %v1571_v17 }
 0x81f   : > { %v3369_v18 = vpop.eup %2914 }
 0x820   : > { %v1573_v19 = vsel %vm1559_vm10, %v3369_v18, 0.0 }
 0x821   : > { %v3373_v20 = vpop.eup %2916  ;;  %1574 = vadd.xlane.f32.xlu0 %v1573_v19 }
 0x822   : > { %v1576_v21 = vsel %vm1563_vm11, %v3373_v20, 0.0 }
 0x823   : > { %1577 = vadd.xlane.f32.xlu1 %v1576_v21 }
 0x837   : > { %1585 = vrot.lane.b32.xlu0 %v3332_v38, %s3591_s5  ;;  %s3597_s5 = smov 24  }
 0x883   : > { %v1692_v22 = vpop.xlane.xlu0 %1691 }
 0x884   : > { %v1696_v23 = vsub.f32 %v1683_v55, %v1692_v22 }
 0x885   : > { %v1695_v24 = vpop.xlane.xlu1 %1694 }
 0x886   : > { %v1698_v25 = vmul.f32 1.442695, %v1696_v23  ;;  %v1697_v26 = vsub.f32 %v1686_v58, %v1695_v24 }
 0x888   : > { %2918 = vpow2.f32 %v1698_v25  ;;  %v1700_v27 = vmul.f32 1.442695, %v1697_v26 }
 0x88a   : > { %2920 = vpow2.f32 %v1700_v27 }
 0x88b   : > { %v1815_v29 = vpop.xlane.xlu0 %1814 }
 0x88c   : > { %v1819_v30 = vsub.f32 %v1806_v61, %v1815_v29 }
 0x88d   : > { %v1818_v31 = vpop.xlane.xlu1 %1817 }
 0x88e   : > { %v1821_v32 = vmul.f32 1.442695, %v1819_v30  ;;  %v1820_v33 = vsub.f32 %v1809_v0, %v1818_v31 }
 0x890   : > { %2922 = vpow2.f32 %v1821_v32  ;;  %v1823_v34 = vmul.f32 1.442695, %v1820_v33 }
 0x892   : > { %v3379_v28 = vpop.eup %2918  ;;  %2924 = vpow2.f32 %v1823_v34 }
 0x893   : > { %v1938_v35 = vpop.xlane.xlu0 %1937  ;;  %v1702_v36 = vsel %vm1559_vm10, %v3379_v28, 0.0 }
 0x894   : > { %v2921_v37 = vpop.eup %2920  ;;  %v1942_v39 = vsub.f32 %v1929_v6, %v1938_v35  ;;  %1703 = vadd.xlane.f32.xlu0 %v1702_v36 }
 0x895   : > { %v1941_v40 = vpop.xlane.xlu1 %1940  ;;  %v1705_v41 = vsel %vm1563_vm11, %v2921_v37, 0.0 }
 0x896   : > { %v1944_v42 = vmul.f32 1.442695, %v1942_v39  ;;  %v1943_v43 = vsub.f32 %v1932_v9, %v1941_v40  ;;  %1706 = vadd.xlane.f32.xlu1 %v1705_v41 }
 0x898   : > { %2926 = vpow2.f32 %v1944_v42  ;;  %v1946_v44 = vmul.f32 1.442695, %v1943_v43  ;;  %v2887_v43 = vld [vmem:[%s3545_s9 + $0x8] sm:$0xff]  }
 0x89a   : > { %v3384_v45 = vpop.eup %2922  ;;  %2928 = vpow2.f32 %v1946_v44 }
 0x89b   : > { %v1825_v46 = vsel %vm1559_vm10, %v3384_v45, 0.0 }
 0x89c   : > { %v2925_v47 = vpop.eup %2924  ;;  %1826 = vadd.xlane.f32.xlu0 %v1825_v46 }
 0x89d   : > { %v1828_v48 = vsel %vm1563_vm11, %v2925_v47, 0.0 }
 0x89e   : > { %1829 = vadd.xlane.f32.xlu1 %v1828_v48 }
 0x8a2   : > { %v3389_v49 = vpop.eup %2926 }
 0x8a3   : > { %v1948_v50 = vsel %vm1559_vm10, %v3389_v49, 0.0 }
 0x8a4   : > { %v3393_v51 = vpop.eup %2928  ;;  %1949 = vadd.xlane.f32.xlu1 %v1948_v50 }
 0x8a5   : > { %v1951_v52 = vsel %vm1563_vm11, %v3393_v51, 0.0 }
 0x8a8   : > { %1952 = vadd.xlane.f32.xlu1 %v1951_v52 }
 0x8ae   : > { %v1575_v55 = vpop.xlane.xlu0 %1574 }
 0x8af   : > { %2930 = vrcp.f32 %v1575_v55 }
 0x8b0   : > { %v1578_v56 = vpop.xlane.xlu1 %1577 }
 0x8b1   : > { %2932 = vrcp.f32 %v1578_v56 }
 0x8b2   : > { %1836 = vrot.lane.b32.xlu0 %v3332_v38, %s3592_s29  ;;  %v1586_v58 = vpop.permute.xlu0 %1585 }
 0x8b3   : > { %v1595_v59 = vand.u32 %v1593_v57, %v1586_v58 }
 0x8b5   : > { %2731 = vmatpush3.bf16.msra.mxu0 %v1595_v59 }
 0x8b6   : > { %1959 = vrot.lane.b32.xlu0 %v3332_v38, %s3593_s4  ;;  %2742 = vmatprep.subr.bf16.mxu0 %v2994_v1 }
 0x8b9   : > { %v2931_v60 = vpop.eup %2930  ;;  %1713 = vrot.lane.b32.xlu1 %v3332_v38, %s3594_s2 }
 0x8ba   : > { %v1581_v62 = vmul.f32 %v2931_v60, %v3369_v18 }
 0x8bb   : > { %v2933_v61 = vpop.eup %2932 }
 0x8bc   : > { %v1582_v63 = vmul.f32 %v2933_v61, %v3373_v20 }
 0x8be   : > { %v1583_v0 = vpack.c.bf16 %v1582_v63, %v1581_v62 }
 0x8c0   : > { %2733 = vmatmul.mubr.msk.bf16.vlgmr.msra.gmra.mrb[32].mxu0 %vm1559_vm10, %v1583_v0 }
 0x8c1   : > { %2744 = vmatprep.mubr.msk.bf16.mxu0 %vm2995_vm0, %v2994_v1 }
 0x921   : > { %v1704_v3 = vpop.xlane.xlu0 %1703 }
 0x923   : > { %v1707_v2 = vpop.xlane.xlu1 %1706 }
 0x924   : > { %2934 = vrcp.f32 %v1707_v2 }
 0x925   : > { %2936 = vrcp.f32 %v1704_v3 }
 0x929   : > { %v1827_v8 = vpop.xlane.xlu0 %1826 }
 0x92b   : > { %v1830_v6 = vpop.xlane.xlu1 %1829 }
 0x92c   : > { %2938 = vrcp.f32 %v1830_v6 }
 0x92d   : > { %2940 = vrcp.f32 %v1827_v8  ;;  %v1837_v13 = vpop.permute.xlu0 %1836 }
 0x92e   : > { %v2935_v9 = vpop.eup %2934  ;;  %v1842_v18 = vand.u32 %v1837_v13, %v1593_v57 }
 0x92f   : > { %v2937_v10 = vpop.eup %2936  ;;  %v1711_v11 = vmul.f32 %v2935_v9, %v2921_v37  ;;  %v2886_v37 = vld [vmem:[%s3545_s9] sm:$0xff]  }
 0x930   : > { %v1710_v15 = vmul.f32 %v2937_v10, %v3379_v28  ;;  %2773 = vmatpush3.bf16.msra.mxu1 %v2886_v37 }
 0x931   : > { %v1950_v7 = vpop.xlane.xlu1 %1949  ;;  %v1960_v22 = vpop.permute.xlu0 %1959  ;;  %2774 = vmatprep.subr.bf16.mxu1 %v2994_v1 }
 0x932   : > { %v1712_v16 = vpack.c.bf16 %v1711_v11, %v1710_v15  ;;  %v1965_v25 = vand.u32 %v1960_v22, %v1593_v57 }
 0x934   : > { %2775 = vmatpush3.bf16.msra.mxu1 %v2887_v43 }
 0x935   : > { %v1953_v38 = vpop.xlane.xlu1 %1952  ;;  %2788 = vmatprep.subr.bf16.mxu1 %v2994_v1 }
 0x936   : > { %2942 = vrcp.f32 %v1953_v38  ;;  %v2939_v17 = vpop.eup %2938 }
 0x937   : > { %2944 = vrcp.f32 %v1950_v7  ;;  %v2941_v19 = vpop.eup %2940  ;;  %v1834_v20 = vmul.f32 %v2939_v17, %v2925_v47  ;;  %v2551_v7 = vld [vmem:[%s3548_s12] ss:$0 sm:$0xff] }
 0x938   : > { %v1833_v21 = vmul.f32 %v2941_v19, %v3384_v45 }
 0x939   : > { %v1714_v12 = vpop.permute.xlu1 %1713 }
 0x93a   : > { %v1719_v14 = vand.u32 %v1714_v12, %v1593_v57  ;;  %v1835_v23 = vpack.c.bf16 %v1834_v20, %v1833_v21 }
 0x93c   : > { %2743 = vmatpush3.bf16.msra.mxu0 %v1719_v14 }
 0x93d   : > { %2754 = vmatprep.subr.bf16.mxu0 %v2994_v1 }
 0x93f   : > { %2745 = vmatmul.mubr.msk.bf16.vlgmr.msra.gmra.mrb[36].mxu0 %vm1559_vm10, %v1712_v16 }
 0x940   : > { %2755 = vmatpush3.bf16.msra.mxu0 %v1842_v18  ;;  %2756 = vmatprep.mubr.msk.bf16.mxu0 %vm2995_vm0, %v2994_v1  ;;  %v2943_v24 = vpop.eup %2942 }
 0x941   : > { %2766 = vmatprep.subr.bf16.mxu0 %v2994_v1  ;;  %v2945_v26 = vpop.eup %2944  ;;  %v1957_v27 = vmul.f32 %v2943_v24, %v3393_v51 }
 0x942   : > { %v1956_v29 = vmul.f32 %v2945_v26, %v3389_v49 }
 0x944   : > { %v1958_v30 = vpack.c.bf16 %v1957_v27, %v1956_v29 }
 0x947   : > { %2757 = vmatmul.mubr.msk.bf16.vlgmr.msra.gmra.mrb[40].mxu0 %vm1559_vm10, %v1835_v23 }
 0x948   : > { %2767 = vmatpush3.bf16.msra.mxu0 %v1965_v25  ;;  %2768 = vmatprep.mubr.msk.bf16.mxu0 %vm2995_vm0, %v2994_v1 }
 0x949   : > { %2780 = vmatprep.subr.bf16.mxu0 %v2994_v1 }
 0x94f   : > { %2769 = vmatmul.mubr.msk.bf16.vlgmr.msra.gmra.mrb[44].mxu0 %vm1559_vm10, %v1958_v30  ;;  %v2889_v30 = vld [vmem:[%s3549_s13 + $0x8] sm:$0xff]  }
 0x950   : > { %2784 = vmatprep.mubr.msk.bf16.mxu0 %vm2995_vm0, %v2994_v1 }
 0x993   : > { %v1631_v31 = vpop.f32.mrb[32].mxu0 }
 0x994   : > { %v2734_v32 = vpop.f32.mrb[33].mxu0 }
 0x995   : > { %v1634_v33 = vpop.f32.mrb[34].mxu0  ;;  %v2891_v32 = vld [vmem:[%s3551_s15 + $0x8] sm:$0xff]  }
 0x996   : > { %v2735_v34 = vpop.f32.mrb[35].mxu0 }
 0x997   : > { %v2893_v34 = vld [vmem:[%s3551_s15 + $0x18] sm:$0xff]  }
 0xa12   : > { %v1755_v28 = vpop.f32.mrb[36].mxu0 }
 0xa13   : > { %v2746_v35 = vpop.f32.mrb[37].mxu0 }
 0xa14   : > { %v1758_v36 = vpop.f32.mrb[38].mxu0  ;;  %v2895_v35 = vld [vmem:[%s3551_s15 + $0x28] sm:$0xff]  }
 0xa15   : > { %v2861_v39 = vpack.i.bf16 %v1758_v36, %v1755_v28  ;;  %v2747_v40 = vpop.f32.mrb[39].mxu0  ;;  %v2894_v28 = vld [vmem:[%s3551_s15 + $0x20] sm:$0xff]  }
 0xa17   : > { %2862 = vrot.lane.b32.xlu1 %v2861_v39, %s3595_s23 }
 0xa1a   : > { %v1878_v41 = vpop.f32.mrb[40].mxu0 }
 0xa1b   : > { %v2758_v42 = vpop.f32.mrb[41].mxu0 }
 0xa1c   : > { %v1881_v44 = vpop.f32.mrb[42].mxu0 }
 0xa1d   : > { %v2866_v45 = vpack.i.bf16 %v1881_v44, %v1878_v41  ;;  %v2759_v46 = vpop.f32.mrb[43].mxu0 }
 0xa1f   : > { %2867 = vrot.lane.b32.xlu0 %v2866_v45, %s3596_s25  ;;  %v2555_v45 = vld [vmem:[%s3553_s17] ss:$0 sm:$0xff] }
 0xa22   : > { %v2001_v47 = vpop.f32.mrb[44].mxu0 }
 0xa23   : > { %v2770_v48 = vpop.f32.mrb[45].mxu0 }
 0xa24   : > { %v2004_v49 = vpop.f32.mrb[46].mxu0 }
 0xa25   : > { %v2871_v50 = vpack.i.bf16 %v2004_v49, %v2001_v47  ;;  %v2771_v51 = vpop.f32.mrb[47].mxu0  ;;  %v2556_v49 = vld [vmem:[%s3554_s18] ss:$0 sm:$0xff] }
 0xa27   : > { %2872 = vrot.lane.b32.xlu1 %v2871_v50, %s3597_s5 }
 0xa89   : > { %v2863_v52 = vpop.permute.xlu1 %2862 }
 0xa8a   : > { %v2865_v54 = vunpack.i.h.bf16 %v2863_v52  ;;  %v2864_v55 = vunpack.i.l.bf16 %v2863_v52 }
 0xa8c   : > { %v2033_v59 = vsel %vm843_vm3, %v1634_v33, %v2865_v54  ;;  %v2032_v60 = vsel %vm843_vm3, %v1631_v31, %v2864_v55  ;;  %v2890_v31 = vld [vmem:[%s3551_s15] sm:$0xff]   ;;  %v2892_v33 = vld [vmem:[%s3551_s15 + $0x10] sm:$0xff]  }
 0xa91   : > { %v2868_v53 = vpop.permute.xlu0 %2867 }
 0xa92   : > { %v2870_v56 = vunpack.i.h.bf16 %v2868_v53  ;;  %v2869_v57 = vunpack.i.l.bf16 %v2868_v53 }
 0xa94   : > { %v2035_v63 = vsel %vm1298_vm7, %v2033_v59, %v2870_v56  ;;  %v2034_v0 = vsel %vm1298_vm7, %v2032_v60, %v2869_v57  ;;  %v2896_v59 = vld [vmem:[%s3551_s15 + $0x30] sm:$0xff]   ;;  %v2897_v60 = vld [vmem:[%s3551_s15 + $0x38] sm:$0xff]  }
 0xa99   : > { %v2873_v58 = vpop.permute.xlu1 %2872 }
 0xa9a   : > { %v2875_v61 = vunpack.i.h.bf16 %v2873_v58  ;;  %v2874_v62 = vunpack.i.l.bf16 %v2873_v58 }
 0xa9c   : > { %v2037_v2 = vsel %vm1300_vm8, %v2035_v63, %v2875_v61  ;;  %v2036_v3 = vsel %vm1300_vm8, %v2034_v0, %v2874_v62  ;;  %v2557_v61 = vld [vmem:[%s3550_s14] ss:$0 sm:$0xff] }
 0xa9d   : > { %v2038_v6 = vpack.c.bf16 %v2037_v2, %v2036_v3 }
 0xa9f   : > { %2777 = vmatmul.mubr.msk.bf16.vlgmr.msra.gmra.mrb[36].mxu1 %vm720_vm2, %v2038_v6 }
 0xaa0   : > { %2804 = vmatprep.mubr.msk.bf16.mxu1 %vm2995_vm0, %v2994_v1  ;;  %2789 = vmatpush3.bf16.msra.mxu1 %v2890_v31 }
 0xaa1   : > { %2790 = vmatprep.subr.bf16.mxu1 %v2994_v1 }
 0xaa4   : > { %2791 = vmatpush3.bf16.msra.mxu1 %v2891_v32 }
 0xaa5   : > { %2792 = vmatprep.subr.bf16.mxu1 %v2994_v1 }
 0xaa8   : > { %2793 = vmatpush3.bf16.msra.mxu1 %v2892_v33 }
 0xaa9   : > { %2794 = vmatprep.subr.bf16.mxu1 %v2994_v1 }
 0xaac   : > { %2795 = vmatpush3.bf16.msra.mxu1 %v2893_v34 }
 0xaad   : > { %2796 = vmatprep.subr.bf16.mxu1 %v2994_v1 }
 0xab0   : > { %2797 = vmatpush3.bf16.msra.mxu1 %v2894_v28 }
 0xab1   : > { %2798 = vmatprep.subr.bf16.mxu1 %v2994_v1 }
 0xab4   : > { %2799 = vmatpush3.bf16.msra.mxu1 %v2895_v35 }
 0xab5   : > { %2800 = vmatprep.subr.bf16.mxu1 %v2994_v1 }
 0xab8   : > { %2801 = vmatpush3.bf16.msra.mxu1 %v2896_v59 }
 0xab9   : > { %2802 = vmatprep.subr.bf16.mxu1 %v2994_v1 }
 0xabc   : > { %2803 = vmatpush3.bf16.msra.mxu1 %v2897_v60 }
 0xb72   : > { %v2099_v8 = vpop.f32.mrb[36].mxu1 }
 0xb73   : > { %v2100_v38 = vadd.f32 %v2551_v7, %v2099_v8  ;;  %v2778_v9 = vpop.f32.mrb[37].mxu1 }
 0xb74   : > { %v2102_v10 = vpop.f32.mrb[38].mxu1 }
 0xb75   : > { %v2109_v11 = vrot.slane %v2100_v38, 5  ;;  %v2103_v12 = vadd.f32 %v2551_v7, %v2102_v10  ;;  %v2779_v14 = vpop.f32.mrb[39].mxu1 }
 0xb77   : > { %v2110_v15 = vrot.slane %v2103_v12, 5  ;;  %v2114_v13 = vadd.f32 %v2109_v11, %v3172_v4 }
 0xb79   : > { %v2119_v16 = vsel %vm2118_vm14, %v2114_v13, 0.0  ;;  %v2111_v17 = vsel %vm2108_vm15, %v2109_v11, %v2110_v15 }
 0xb7a   : > { %2120 = vadd.xlane.f32.xlu0 %v2119_v16  ;;  %v2115_v18 = vadd.f32 %v2111_v17, %v3174_v5  ;;  %v2888_v5 = vld [vmem:[%s3549_s13] sm:$0xff]  }
 0xb7b   : > { %2781 = vmatpush3.bf16.msra.mxu0 %v2888_v5 }
 0xb7c   : > { %v2122_v19 = vsel %vm1370_vm1, %v2115_v18, 0.0  ;;  %2782 = vmatprep.subr.bf16.mxu0 %v2994_v1  ;;  %v2561_v1 = vld [vmem:[%s3552_s16] ss:$0 sm:$0xff] }
 0xb7d   : > { %2123 = vadd.xlane.f32.xlu1 %v2122_v19 }
 0xb7f   : > { %2783 = vmatpush3.bf16.msra.mxu0 %v2889_v30 }
 0xc07   : > { %v2121_v20 = vpop.xlane.xlu0 %2120 }
 0xc08   : > { %v2126_v21 = vmul.f32 0.03125, %v2121_v20 }
 0xc0a   : > { %v2128_v22 = vsub.f32 %v2114_v13, %v2126_v21  ;;  %v2124_v23 = vpop.xlane.xlu1 %2123 }
 0xc0b   : > { %v2127_v24 = vmul.f32 0.03125, %v2124_v23 }
 0xc0c   : > { %v2130_v25 = vmul.f32 %v2128_v22, %v2128_v22 }
 0xc0d   : > { %v2129_v26 = vsub.f32 %v2115_v18, %v2127_v24 }
 0xc0e   : > { %v2132_v27 = vsel %vm2118_vm14, %v2130_v25, 0.0 }
 0xc0f   : > { %2133 = vadd.xlane.f32.xlu0 %v2132_v27  ;;  %v2131_v4 = vmul.f32 %v2129_v26, %v2129_v26 }
 0xc11   : > { %v2135_v29 = vsel %vm1370_vm1, %v2131_v4, 0.0 }
 0xc13   : > { %2136 = vadd.xlane.f32.xlu0 %v2135_v29 }
 0xc9c   : > { %v2134_v36 = vpop.xlane.xlu0 %2133 }
 0xc9d   : > { %v2138_v37 = vmul.f32 0.03125, %v2134_v36 }
 0xc9f   : > { %v2140_v39 = vadd.f32 1e-05, %v2138_v37  ;;  %v2570_v37 = vld [vmem:[%s3555_s19] ss:$0 sm:$0xff] }
 0xca0   : > { %v2137_v40 = vpop.xlane.xlu0 %2136 }
 0xca1   : > { %2946 = vrsqrt.f32 %v2140_v39  ;;  %v2139_v41 = vmul.f32 0.03125, %v2137_v40  ;;  %v2571_v40 = vld [vmem:[%s3556_s20] ss:$0 sm:$0xff] }
 0xca3   : > { %v2141_v42 = vadd.f32 1e-05, %v2139_v41 }
 0xca5   : > { %2948 = vrsqrt.f32 %v2141_v42 }
 0xcab   : > { %v2947_v43 = vpop.eup %2946 }
 0xcac   : > { %v2144_v44 = vmul.f32 %v2947_v43, %v2128_v22 }
 0xcae   : > { %v2152_v47 = vmul.f32 %v2555_v45, %v2144_v44 }
 0xcaf   : > { %v2949_v46 = vpop.eup %2948 }
 0xcb0   : > { %v2145_v48 = vmul.f32 %v2949_v46, %v2129_v26  ;;  %v2160_v51 = vadd.f32 %v2556_v49, %v2152_v47 }
 0xcb2   : > { %v2153_v50 = vmul.f32 %v2555_v45, %v2145_v48 }
 0xcb4   : > { %v2161_v52 = vadd.f32 %v2556_v49, %v2153_v50 }
 0xcb6   : > { %v2162_v53 = vpack.c.bf16 %v2161_v52, %v2160_v51 }
 0xcb8   : > { %v2175_v54 = vshrl.u32 %v2162_v53, 16  ;;  %v2178_v55 = vshll.u32 %v2162_v53, 16 }
 0xcba   : > { %v2177_v56 = vrot.slane %v2175_v54, 1  ;;  %v2180_v57 = vrot.slane %v2178_v55, 2 }
 0xcbc   : > { %v2181_v58 = vor.u32 %v2180_v57, %v2177_v56 }
 0xcbe   : > { %2785 = vmatmul.mubr.msk.bf16.vlgmr.msra.gmra.mrb[48].mxu0 %vm720_vm2, %v2181_v58 }
 0xd91   : > { %v2231_v62 = vpop.f32.mrb[48].mxu0 }
 0xd92   : > { %v2232_v63 = vadd.f32 %v2557_v61, %v2231_v62  ;;  %v2786_v0 = vpop.f32.mrb[49].mxu0 }
 0xd93   : > { %v2234_v2 = vpop.f32.mrb[50].mxu0 }
 0xd94   : > { %v2235_v3 = vadd.f32 %v2557_v61, %v2234_v2  ;;  %v2787_v6 = vpop.f32.mrb[51].mxu0  ;;  %v2238_v7 = vmax.f32 %v2232_v63, 0.0 }
 0xd96   : > { %v2239_v8 = vmax.f32 %v2235_v3, 0.0 }
 0xd98   : > { %v2240_v38 = vpack.c.bf16 %v2239_v8, %v2238_v7 }
 0xd9a   : > { %2805 = vmatmul.mubr.bf16.vlgmr.msra.gmra.mrb[40].mxu1 %v2240_v38 }
 0xe6d   : > { %v2346_v9 = vpop.f32.mrb[40].mxu1 }
 0xe6e   : > { %v2347_v10 = vadd.f32 %v2561_v1, %v2346_v9  ;;  %v2806_v11 = vpop.f32.mrb[41].mxu1 }
 0xe6f   : > { %v2349_v12 = vpop.f32.mrb[42].mxu1 }
 0xe70   : > { %v2355_v14 = vrot.slane %v2347_v10, 5  ;;  %v2350_v15 = vadd.f32 %v2561_v1, %v2349_v12  ;;  %v2807_v13 = vpop.f32.mrb[43].mxu1 }
 0xe72   : > { %v2356_v16 = vrot.slane %v2350_v15, 5  ;;  %v2360_v17 = vadd.f32 %v2355_v14, %v2160_v51 }
 0xe74   : > { %v2364_v18 = vsel %vm2118_vm14, %v2360_v17, 0.0  ;;  %v2357_v19 = vsel %vm2108_vm15, %v2355_v14, %v2356_v16 }
 0xe75   : > { %2365 = vadd.xlane.f32.xlu1 %v2364_v18  ;;  %v2361_v20 = vadd.f32 %v2357_v19, %v2161_v52 }
 0xe77   : > { %v2367_v21 = vsel %vm1370_vm1, %v2361_v20, 0.0 }
 0xe78   : > { %2368 = vadd.xlane.f32.xlu0 %v2367_v21 }
 0xf02   : > { %v2366_v22 = vpop.xlane.xlu1 %2365 }
 0xf03   : > { %v2370_v23 = vmul.f32 0.03125, %v2366_v22 }
 0xf05   : > { %v2372_v24 = vsub.f32 %v2360_v17, %v2370_v23  ;;  %v2369_v25 = vpop.xlane.xlu0 %2368 }
 0xf06   : > { %v2371_v26 = vmul.f32 0.03125, %v2369_v25 }
 0xf07   : > { %v2374_v27 = vmul.f32 %v2372_v24, %v2372_v24 }
 0xf08   : > { %v2373_v4 = vsub.f32 %v2361_v20, %v2371_v26 }
 0xf09   : > { %v2376_v29 = vsel %vm2118_vm14, %v2374_v27, 0.0 }
 0xf0a   : > { %2377 = vadd.xlane.f32.xlu1 %v2376_v29  ;;  %v2375_v5 = vmul.f32 %v2373_v4, %v2373_v4 }
 0xf0c   : > { %v2379_v30 = vsel %vm1370_vm1, %v2375_v5, 0.0 }
 0xf0d   : > { %2380 = vadd.xlane.f32.xlu0 %v2379_v30 }
 0xf97   : > { %v2378_v31 = vpop.xlane.xlu1 %2377 }
 0xf98   : > { %v2382_v32 = vmul.f32 0.03125, %v2378_v31 }
 0xf9a   : > { %v2384_v33 = vadd.f32 1e-05, %v2382_v32  ;;  %v2381_v34 = vpop.xlane.xlu0 %2380 }
 0xf9b   : > { %v2383_v28 = vmul.f32 0.03125, %v2381_v34 }
 0xf9c   : > { %2950 = vrsqrt.f32 %v2384_v33 }
 0xf9d   : > { %v2385_v35 = vadd.f32 1e-05, %v2383_v28 }
 0xf9f   : > { %2952 = vrsqrt.f32 %v2385_v35 }
 0xfa6   : > { %v2951_v36 = vpop.eup %2950 }
 0xfa7   : > { %v2388_v39 = vmul.f32 %v2951_v36, %v2372_v24 }
 0xfa9   : > { %v2953_v41 = vpop.eup %2952  ;;  %v2396_v42 = vmul.f32 %v2570_v37, %v2388_v39 }
 0xfaa   : > { %v2389_v43 = vmul.f32 %v2953_v41, %v2373_v4 }
 0xfab   : > { %v2404_v44 = vadd.f32 %v2571_v40, %v2396_v42 }
 0xfac   : > { %v2397_v45 = vmul.f32 %v2570_v37, %v2389_v43 }
 0xfad   : > { %2407 = vst.msk [vmem:[%s3317_s30] sm:$0xf8] %vm2118_vm14, %v2404_v44 }
 0xfae   : > { %v2405_v46 = vadd.f32 %v2571_v40, %v2397_v45 }
 0xfb0   : > { %2408 = vst.msk [vmem:[%s3317_s30 + $0x8] sm:$0x7f] %vm1370_vm1, %v2405_v46 }
 0xfb1 PF: > { %s31_s3 = sadd.s32 1, %s2992_s3   ;;  %s3598_s25 = sld [smem:[#allocation3_spill]] }
 0xfb2   : > { %p28_p7 = scmp.ge.s32.totalorder %s31_s3, 10   ;;  %s3599_s0 = sld [smem:[#allocation4_spill]] }
 0xfb3   : > { %s3600_s27 = sld [smem:[#allocation5_spill]]  ;;  %s3601_s2 = smov %s2984_s26 }
 0xfb4   :  { %30 = sbr.rel (!%p28_p7) target bundleno = 7 (0x7), region = 134 }
 0xfb8   : > { %s3602_s26 = smov %s3599_s0 }

</bundles_post_ra>
